<compile_context>
chip_gen: v7x
topology: tpu7x:2x2x1
jax: 0.10.0
libtpu: 0.0.40
codegen_flags: <defaults>
</compile_context>

<pallas_src>
import math
import functools

import jax
import jax.numpy as jnp
from jax import lax
from jax.experimental import pallas as pl
from jax.experimental.pallas import tpu as pltpu


# ----------------------------------------------------------------------------- utils

def _round_up(x, m):
    return ((x + m - 1) // m) * m


class KeyGen:
    def __init__(self, key):
        self.key = key

    def __call__(self):
        self.key, sub = jax.random.split(self.key)
        return sub


# ----------------------------------------------------------------------------- tiled matmul (bf16 MXU, f32 acc)

def _pick_bm(M):
    if M <= 256:
        Mp = _round_up(M, 16)
        return Mp, Mp
    Mp = _round_up(M, 256)
    return Mp, 256


def _pick_bk(K):
    if K <= 2880:                       # single K step, block == full dim (no padding)
        return K, K
    for d in range(16, 0, -1):          # largest 128-multiple <= 2048 that divides K
        bk = 128 * d
        if K % bk == 0:
            return K, bk
    Kp = _round_up(K, 512)
    return Kp, 512


def _pick_bn(N):
    if N <= 1280:                       # full-N block (lane-dense output, no padding)
        return N, N
    for bn in (512, 384, 256, 128):
        if N % bn == 0:
            return N, bn
    return _round_up(N, 256), 256


def _mm_kernel(x_ref, w_ref, b_ref, o_ref, acc_ref, *, act):
    @pl.when(pl.program_id(2) == 0)
    def _():
        acc_ref[...] = jnp.zeros_like(acc_ref)

    acc_ref[...] += jnp.dot(x_ref[...], w_ref[...],
                            preferred_element_type=jnp.float32)

    @pl.when(pl.program_id(2) == pl.num_programs(2) - 1)
    def _():
        y = acc_ref[...] + b_ref[...]
        if act == "silu":
            y = y * jax.nn.sigmoid(y)
        o_ref[...] = y.astype(o_ref.dtype)


def _mm_res_kernel(x_ref, w_ref, b_ref, r_ref, o_ref, acc_ref, *, act):
    @pl.when(pl.program_id(2) == 0)
    def _():
        acc_ref[...] = jnp.zeros_like(acc_ref)

    acc_ref[...] += jnp.dot(x_ref[...], w_ref[...],
                            preferred_element_type=jnp.float32)

    @pl.when(pl.program_id(2) == pl.num_programs(2) - 1)
    def _():
        y = acc_ref[...] + b_ref[...]
        if act == "silu":
            y = y * jax.nn.sigmoid(y)
        y = y + r_ref[...].astype(jnp.float32)      # fused residual add
        o_ref[...] = y.astype(o_ref.dtype)


@functools.partial(jax.jit, static_argnames=("act", "out_dtype"))
def matmul(x, w, b=None, res=None, act=None, out_dtype=jnp.bfloat16):
    """y = act(x @ w + b) (+ res); bf16 operands, f32 accumulation on the MXU."""
    M, K = x.shape
    Kw, N = w.shape
    assert K == Kw
    x = x.astype(jnp.bfloat16)
    w = w.astype(jnp.bfloat16)

    Mp, bm = _pick_bm(M)
    Kp, bk = _pick_bk(K)
    Np, bn = _pick_bn(N)

    xp = x if (Mp == M and Kp == K) else jnp.pad(x, ((0, Mp - M), (0, Kp - K)))
    wp = w if (Kp == K and Np == N) else jnp.pad(w, ((0, Kp - K), (0, Np - N)))
    if b is None:
        bp = jnp.zeros((1, Np), jnp.float32)
    else:
        bp = b.reshape(1, N).astype(jnp.float32)
        if Np != N:
            bp = jnp.pad(bp, ((0, 0), (0, Np - N)))

    in_specs = [
        pl.BlockSpec((bm, bk), lambda i, j, k: (i, k)),
        pl.BlockSpec((bk, bn), lambda i, j, k: (k, j)),
        pl.BlockSpec((1, bn), lambda i, j, k: (0, j)),
    ]
    if res is not None:
        rp = res.astype(jnp.bfloat16)
        if (Mp, Np) != (M, N):
            rp = jnp.pad(rp, ((0, Mp - M), (0, Np - N)))
        in_specs.append(pl.BlockSpec((bm, bn), lambda i, j, k: (i, j)))
        kern = functools.partial(_mm_res_kernel, act=act)
        args = (xp, wp, bp, rp)
    else:
        kern = functools.partial(_mm_kernel, act=act)
        args = (xp, wp, bp)

    out = pl.pallas_call(
        kern,
        out_shape=jax.ShapeDtypeStruct((Mp, Np), out_dtype),
        grid_spec=pltpu.PrefetchScalarGridSpec(
            num_scalar_prefetch=0,
            grid=(Mp // bm, Np // bn, Kp // bk),
            in_specs=in_specs,
            out_specs=pl.BlockSpec((bm, bn), lambda i, j, k: (i, j)),
            scratch_shapes=[pltpu.VMEM((bm, bn), jnp.float32)],
        ),
        compiler_params=pltpu.CompilerParams(
            dimension_semantics=("parallel", "parallel", "arbitrary"),
            vmem_limit_bytes=48 * 1024 * 1024),
    )(*args)
    if (Mp, Np) != (M, N):
        out = out[:M, :N]
    return out


# ----------------------------------------------------------------------------- conv (im2col + matmul)

@functools.partial(jax.jit, static_argnames=("ksize", "stride", "padding", "act"))
def conv2d(x, w, b, res=None, *, ksize, stride=1, padding=0, act=None):
    """x: NHWC (bf16/f32).  w: (ksize*ksize*Cin, Cout), rows ordered (kh, kw, cin)."""
    N, H, W, C = x.shape
    Cout = w.shape[1]
    if ksize == 1:
        r2 = None if res is None else res.reshape(N * H * W, Cout)
        y = matmul(x.reshape(N * H * W, C), w, b=b, res=r2, act=act)
        return y.reshape(N, H, W, Cout)
    Ho = (H + 2 * padding - ksize) // stride + 1
    Wo = (W + 2 * padding - ksize) // stride + 1
    xp = jnp.pad(x, ((0, 0), (padding, padding), (padding, padding), (0, 0)))
    cols = []
    for kh in range(ksize):
        for kw in range(ksize):
            cols.append(lax.slice(
                xp,
                (0, kh, kw, 0),
                (N, kh + (Ho - 1) * stride + 1, kw + (Wo - 1) * stride + 1, C),
                (1, stride, stride, 1)))
    patches = jnp.concatenate(cols, axis=-1).reshape(N * Ho * Wo, ksize * ksize * C)
    r2 = None if res is None else res.reshape(N * Ho * Wo, Cout)
    y = matmul(patches, w, b=b, res=r2, act=act)
    return y.reshape(N, Ho, Wo, Cout)


# ----------------------------------------------------------------------------- group norm kernel (+fused SiLU)

def _groupnorm_kernel(x_ref, g_ref, b_ref, oh_ref, oht_ref, o_ref, *, eps, inv_cnt, silu):
    x = x_ref[0].astype(jnp.float32)                  # (HW, C)
    oh = oh_ref[...]                                  # (C, G)
    oht = oht_ref[...]                                # (G, C)
    s = jnp.sum(x, axis=0, keepdims=True)             # per-channel sums (1, C)
    mean_g = jnp.dot(s, oh, preferred_element_type=jnp.float32) * inv_cnt      # (1, G)
    mean_c = jnp.dot(mean_g, oht, preferred_element_type=jnp.float32)          # (1, C)
    d = x - mean_c
    ss = jnp.sum(d * d, axis=0, keepdims=True)        # centered second moment (safer)
    var_g = jnp.dot(ss, oh, preferred_element_type=jnp.float32) * inv_cnt
    inv_c = jnp.dot(lax.rsqrt(var_g + eps), oht, preferred_element_type=jnp.float32)
    y = d * inv_c * g_ref[...] + b_ref[...]
    if silu:
        y = y * jax.nn.sigmoid(y)
    o_ref[0] = y.astype(o_ref.dtype)


@functools.partial(jax.jit, static_argnames=("groups", "eps", "silu"))
def group_norm(x, gamma, beta, groups=32, eps=1e-5, silu=False):
    """NHWC GroupNorm(groups, C) (+ optional fused SiLU); stats in f32, output bf16."""
    N, H, W, C = x.shape
    HW = H * W
    cg = C // groups
    x2 = x.reshape(N, HW, C)
    oh = (jnp.arange(C)[:, None] // cg == jnp.arange(groups)[None, :]).astype(jnp.float32)
    out = pl.pallas_call(
        functools.partial(_groupnorm_kernel, eps=eps, inv_cnt=1.0 / (HW * cg), silu=silu),
        out_shape=jax.ShapeDtypeStruct((N, HW, C), jnp.bfloat16),
        grid_spec=pltpu.PrefetchScalarGridSpec(
            num_scalar_prefetch=0,
            grid=(N,),
            in_specs=[
                pl.BlockSpec((1, HW, C), lambda n: (n, 0, 0)),
                pl.BlockSpec((1, C), lambda n: (0, 0)),
                pl.BlockSpec((1, C), lambda n: (0, 0)),
                pl.BlockSpec((C, groups), lambda n: (0, 0)),
                pl.BlockSpec((groups, C), lambda n: (0, 0)),
            ],
            out_specs=pl.BlockSpec((1, HW, C), lambda n: (n, 0, 0)),
        ),
        compiler_params=pltpu.CompilerParams(dimension_semantics=("parallel",)),
    )(x2, gamma.reshape(1, C), beta.reshape(1, C), oh, oh.T)
    return out.reshape(N, H, W, C)


# ----------------------------------------------------------------------------- layer norm kernel

def _layernorm_kernel(x_ref, g_ref, b_ref, o_ref, *, eps):
    x = x_ref[...].astype(jnp.float32)
    mean = jnp.mean(x, axis=-1, keepdims=True)
    xc = x - mean
    var = jnp.mean(xc * xc, axis=-1, keepdims=True)
    o_ref[...] = (xc * lax.rsqrt(var + eps) * g_ref[...] + b_ref[...]).astype(o_ref.dtype)


@functools.partial(jax.jit, static_argnames=("eps",))
def layer_norm(x2d, gamma, beta, eps=1e-5):
    M, C = x2d.shape
    tm = 256 if M % 256 == 0 else (128 if M % 128 == 0 else M)
    return pl.pallas_call(
        functools.partial(_layernorm_kernel, eps=eps),
        out_shape=jax.ShapeDtypeStruct((M, C), jnp.bfloat16),
        grid_spec=pltpu.PrefetchScalarGridSpec(
            num_scalar_prefetch=0,
            grid=(M // tm,),
            in_specs=[
                pl.BlockSpec((tm, C), lambda i: (i, 0)),
                pl.BlockSpec((1, C), lambda i: (0, 0)),
                pl.BlockSpec((1, C), lambda i: (0, 0)),
            ],
            out_specs=pl.BlockSpec((tm, C), lambda i: (i, 0)),
        ),
        compiler_params=pltpu.CompilerParams(dimension_semantics=("parallel",)),
    )(x2d, gamma.reshape(1, C), beta.reshape(1, C))


# ----------------------------------------------------------------------------- GEGLU gate kernel (halves read in-kernel)

def _geglu_kernel(a_ref, g_ref, o_ref):
    a = a_ref[...].astype(jnp.float32)
    g = g_ref[...].astype(jnp.float32)
    o_ref[...] = (a * (g * jax.nn.sigmoid(g))).astype(o_ref.dtype)


@jax.jit
def geglu(g_full):
    """g_full: (M, 8C) -> (M, 4C) = g_full[:, :4C] * silu(g_full[:, 4C:]);
    the two halves are read via column-offset BlockSpecs on the same array (no wrapper slice)."""
    M, C8 = g_full.shape
    C4 = C8 // 2
    tm = 256 if M % 256 == 0 else (128 if M % 128 == 0 else M)
    return pl.pallas_call(
        _geglu_kernel,
        out_shape=jax.ShapeDtypeStruct((M, C4), jnp.bfloat16),
        grid_spec=pltpu.PrefetchScalarGridSpec(
            num_scalar_prefetch=0,
            grid=(M // tm,),
            in_specs=[
                pl.BlockSpec((tm, C4), lambda i: (i, 0)),   # first half
                pl.BlockSpec((tm, C4), lambda i: (i, 1)),   # gate half
            ],
            out_specs=pl.BlockSpec((tm, C4), lambda i: (i, 0)),
        ),
        compiler_params=pltpu.CompilerParams(dimension_semantics=("parallel",)),
    )(g_full, g_full)


# ----------------------------------------------------------------------------- attention kernels (lane-dense, heads in-kernel)

def _attn_heads(q_all, kv, o_ref, n_heads, dh, scale):
    C = n_heads * dh
    for h in range(n_heads):
        q = q_all[:, h * dh:(h + 1) * dh]
        k = kv[:, h * dh:(h + 1) * dh]
        v = kv[:, C + h * dh:C + (h + 1) * dh]
        s = lax.dot_general(q, k, (((1,), (1,)), ((), ())),
                            preferred_element_type=jnp.float32) * scale
        s = s - jnp.max(s, axis=-1, keepdims=True)
        p = jnp.exp(s)
        p = p * pl.reciprocal(jnp.sum(p, axis=-1, keepdims=True), approx=True)
        o = jnp.dot(p.astype(jnp.bfloat16), v, preferred_element_type=jnp.float32)
        o_ref[0, :, h * dh:(h + 1) * dh] = o.astype(o_ref.dtype)


def _self_attn_kernel(qkv_ref, o_ref, *, n_heads, dh, scale):
    qkv = qkv_ref[0]                      # (S, 3C)
    C = n_heads * dh
    _attn_heads(qkv[:, :C], qkv[:, C:], o_ref, n_heads, dh, scale)


def _cross_attn_kernel(q_ref, kv_ref, o_ref, *, n_heads, dh, scale):
    _attn_heads(q_ref[0], kv_ref[0], o_ref, n_heads, dh, scale)


@functools.partial(jax.jit, static_argnames=("n_heads",))
def self_attention_core(qkv, n_heads):
    N, S, C3 = qkv.shape
    C = C3 // 3
    dh = C // n_heads
    return pl.pallas_call(
        functools.partial(_self_attn_kernel, n_heads=n_heads, dh=dh,
                          scale=1.0 / math.sqrt(dh)),
        out_shape=jax.ShapeDtypeStruct((N, S, C), jnp.bfloat16),
        grid_spec=pltpu.PrefetchScalarGridSpec(
            num_scalar_prefetch=0,
            grid=(N,),
            in_specs=[pl.BlockSpec((1, S, C3), lambda n: (n, 0, 0))],
            out_specs=pl.BlockSpec((1, S, C), lambda n: (n, 0, 0)),
        ),
        compiler_params=pltpu.CompilerParams(dimension_semantics=("parallel",)),
    )(qkv)


@functools.partial(jax.jit, static_argnames=("n_heads",))
def cross_attention_core(q, kv, n_heads):
    N, Sq, C = q.shape
    _, Sk, _ = kv.shape
    dh = C // n_heads
    return pl.pallas_call(
        functools.partial(_cross_attn_kernel, n_heads=n_heads, dh=dh,
                          scale=1.0 / math.sqrt(dh)),
        out_shape=jax.ShapeDtypeStruct((N, Sq, C), jnp.bfloat16),
        grid_spec=pltpu.PrefetchScalarGridSpec(
            num_scalar_prefetch=0,
            grid=(N,),
            in_specs=[
                pl.BlockSpec((1, Sq, C), lambda n: (n, 0, 0)),
                pl.BlockSpec((1, Sk, 2 * C), lambda n: (n, 0, 0)),
            ],
            out_specs=pl.BlockSpec((1, Sq, C), lambda n: (n, 0, 0)),
        ),
        compiler_params=pltpu.CompilerParams(dimension_semantics=("parallel",)),
    )(q, kv)


# ----------------------------------------------------------------------------- parameter init (bf16 weights, f32 biases)

def init_linear(kg, in_f, out_f, bias=True):
    p = {"w": (jax.random.normal(kg(), (in_f, out_f), jnp.bfloat16)
               / math.sqrt(in_f)).astype(jnp.bfloat16)}
    if bias:
        p["b"] = 0.01 * jax.random.normal(kg(), (out_f,), jnp.float32)
    return p


def init_conv(kg, in_c, out_c, k):
    fan = in_c * k * k
    return {"w": (jax.random.normal(kg(), (k * k * in_c, out_c), jnp.bfloat16)
                  / math.sqrt(fan)).astype(jnp.bfloat16),
            "b": 0.01 * jax.random.normal(kg(), (out_c,), jnp.float32)}


def init_norm(c):
    return {"g": jnp.ones((c,), jnp.float32), "b": jnp.zeros((c,), jnp.float32)}


def init_time_embedding(kg, dim):
    return {"l1": init_linear(kg, dim, 4 * dim), "l2": init_linear(kg, 4 * dim, 4 * dim)}


def init_resblock(kg, in_c, out_c, n_time=1280):
    p = {"gn_f": init_norm(in_c),
         "conv_f": init_conv(kg, in_c, out_c, 3),
         "lin_t": init_linear(kg, n_time, out_c),
         "gn_m": init_norm(out_c),
         "conv_m": init_conv(kg, out_c, out_c, 3)}
    if in_c != out_c:
        p["res"] = init_conv(kg, in_c, out_c, 1)
    return p


def init_attnblock(kg, n_head, n_embd, d_context=768):
    c = n_head * n_embd
    return {"gn": init_norm(c),
            "conv_in": init_conv(kg, c, c, 1),
            "ln1": init_norm(c),
            "attn1_in": init_linear(kg, c, 3 * c, bias=False),
            "attn1_out": init_linear(kg, c, c),
            "ln2": init_norm(c),
            "attn2_q": init_linear(kg, c, c, bias=False),
            "attn2_kv": init_linear(kg, d_context, 2 * c, bias=False),   # k|v packed
            "attn2_out": init_linear(kg, c, c),
            "ln3": init_norm(c),
            "geglu1": init_linear(kg, c, 4 * c * 2),
            "geglu2": init_linear(kg, 4 * c, c),
            "conv_out": init_conv(kg, c, c, 1)}


def init_upsample(kg, c):
    return {"conv": init_conv(kg, c, c, 3)}


def init_unet(kg):
    enc = [
        [{"conv": init_conv(kg, 4, 320, 3)}],
        [{"res": init_resblock(kg, 320, 320)}, {"attn": init_attnblock(kg, 8, 40)}],
        [{"res": init_resblock(kg, 320, 320)}, {"attn": init_attnblock(kg, 8, 40)}],
        [{"conv_s2": init_conv(kg, 320, 320, 3)}],
        [{"res": init_resblock(kg, 320, 640)}, {"attn": init_attnblock(kg, 8, 80)}],
        [{"res": init_resblock(kg, 640, 640)}, {"attn": init_attnblock(kg, 8, 80)}],
        [{"conv_s2": init_conv(kg, 640, 640, 3)}],
        [{"res": init_resblock(kg, 640, 1280)}, {"attn": init_attnblock(kg, 8, 160)}],
        [{"res": init_resblock(kg, 1280, 1280)}, {"attn": init_attnblock(kg, 8, 160)}],
        [{"conv_s2": init_conv(kg, 1280, 1280, 3)}],
        [{"res": init_resblock(kg, 1280, 1280)}],
        [{"res": init_resblock(kg, 1280, 1280)}],
    ]
    bottleneck = [{"res": init_resblock(kg, 1280, 1280)},
                  {"attn": init_attnblock(kg, 8, 160)},
                  {"res": init_resblock(kg, 1280, 1280)}]
    dec = [
        [{"res": init_resblock(kg, 2560, 1280)}],
        [{"res": init_resblock(kg, 2560, 1280)}],
        [{"res": init_resblock(kg, 2560, 1280)}, {"up": init_upsample(kg, 1280)}],
        [{"res": init_resblock(kg, 2560, 1280)}, {"attn": init_attnblock(kg, 8, 160)}],
        [{"res": init_resblock(kg, 2560, 1280)}, {"attn": init_attnblock(kg, 8, 160)}],
        [{"res": init_resblock(kg, 1920, 1280)}, {"attn": init_attnblock(kg, 8, 160)},
         {"up": init_upsample(kg, 1280)}],
        [{"res": init_resblock(kg, 1920, 640)}, {"attn": init_attnblock(kg, 8, 80)}],
        [{"res": init_resblock(kg, 1280, 640)}, {"attn": init_attnblock(kg, 8, 80)}],
        [{"res": init_resblock(kg, 960, 640)}, {"attn": init_attnblock(kg, 8, 80)},
         {"up": init_upsample(kg, 640)}],
        [{"res": init_resblock(kg, 960, 320)}, {"attn": init_attnblock(kg, 8, 40)}],
        [{"res": init_resblock(kg, 640, 320)}, {"attn": init_attnblock(kg, 8, 40)}],
        [{"res": init_resblock(kg, 640, 320)}, {"attn": init_attnblock(kg, 8, 40)}],
    ]
    return {"enc": enc, "bottleneck": bottleneck, "dec": dec}


def init_diffusion(kg):
    return {"time_embedding": init_time_embedding(kg, 320),
            "unet": init_unet(kg),
            "final": {"gn": init_norm(320), "conv": init_conv(kg, 320, 4, 3)}}


# ----------------------------------------------------------------------------- forward passes

def self_attention_fwd(p, x, n_heads=8):
    N, S, C = x.shape
    qkv = matmul(x.reshape(N * S, C), p["attn1_in"]["w"], b=None)   # (N*S, 3C), no bias
    return self_attention_core(qkv.reshape(N, S, 3 * C), n_heads=n_heads)


def cross_attention_fwd(p, x, context, n_heads=8):
    N, Sq, C = x.shape
    _, Sk, Dc = context.shape
    q = matmul(x.reshape(N * Sq, C), p["attn2_q"]["w"], b=None).reshape(N, Sq, C)
    kv = matmul(context.reshape(N * Sk, Dc), p["attn2_kv"]["w"], b=None).reshape(N, Sk, 2 * C)
    return cross_attention_core(q, kv, n_heads=n_heads)


def attnblock_fwd(p, x, context):
    N, H, W, C = x.shape
    S = H * W
    residue_1 = x
    h = group_norm(x, p["gn"]["g"], p["gn"]["b"], eps=1e-6, silu=False)
    h = conv2d(h, p["conv_in"]["w"], p["conv_in"]["b"], ksize=1)
    tok = h.reshape(N, S, C)                          # == (n, c, h*w).transpose(-1,-2)

    res2 = tok
    t = layer_norm(tok.reshape(N * S, C), p["ln1"]["g"], p["ln1"]["b"]).reshape(N, S, C)
    a = self_attention_fwd(p, t)
    tok = matmul(a.reshape(N * S, C), p["attn1_out"]["w"], b=p["attn1_out"]["b"],
                 res=res2.reshape(N * S, C)).reshape(N, S, C)        # + residue fused

    res2 = tok
    t = layer_norm(tok.reshape(N * S, C), p["ln2"]["g"], p["ln2"]["b"]).reshape(N, S, C)
    a = cross_attention_fwd(p, t, context)
    tok = matmul(a.reshape(N * S, C), p["attn2_out"]["w"], b=p["attn2_out"]["b"],
                 res=res2.reshape(N * S, C)).reshape(N, S, C)        # + residue fused

    res2 = tok
    t = layer_norm(tok.reshape(N * S, C), p["ln3"]["g"], p["ln3"]["b"])
    g = matmul(t, p["geglu1"]["w"], b=p["geglu1"]["b"])              # (N*S, 8C)
    t = geglu(g)                                                     # x * silu(gate), chunk in-kernel
    tok = matmul(t, p["geglu2"]["w"], b=p["geglu2"]["b"],
                 res=res2.reshape(N * S, C)).reshape(N, S, C)        # + residue fused

    h = tok.reshape(N, H, W, C)
    # conv_output + residue_1 fused in the 1x1-conv matmul epilogue
    return conv2d(h, p["conv_out"]["w"], p["conv_out"]["b"], res=residue_1, ksize=1)


def resblock_fwd(p, feature, time_silu):
    residue = feature
    h = group_norm(feature, p["gn_f"]["g"], p["gn_f"]["b"], eps=1e-5, silu=True)
    # linear_time on silu(time); its broadcast add is folded into conv_feature's bias
    t = matmul(time_silu, p["lin_t"]["w"], b=p["lin_t"]["b"], out_dtype=jnp.float32)  # (1, out_c)
    fused_bias = p["conv_f"]["b"] + t[0]
    h = conv2d(h, p["conv_f"]["w"], fused_bias, ksize=3, stride=1, padding=1)
    merged = group_norm(h, p["gn_m"]["g"], p["gn_m"]["b"], eps=1e-5, silu=True)
    if "res" in p:
        residue = conv2d(residue, p["res"]["w"], p["res"]["b"], ksize=1)
    # conv_merged + residual fused in the matmul epilogue
    return conv2d(merged, p["conv_m"]["w"], p["conv_m"]["b"], res=residue,
                  ksize=3, stride=1, padding=1)


def upsample_fwd(p, x):
    x = jnp.repeat(jnp.repeat(x, 2, axis=1), 2, axis=2)      # nearest, scale_factor=2 (glue)
    return conv2d(x, p["conv"]["w"], p["conv"]["b"], ksize=3, stride=1, padding=1)


def apply_layer(layer, x, context, time_silu):
    kind, p = next(iter(layer.items()))
    if kind == "res":
        return resblock_fwd(p, x, time_silu)
    if kind == "attn":
        return attnblock_fwd(p, x, context)
    if kind == "conv":
        return conv2d(x, p["w"], p["b"], ksize=3, stride=1, padding=1)
    if kind == "conv_s2":
        return conv2d(x, p["w"], p["b"], ksize=3, stride=2, padding=1)
    if kind == "up":
        return upsample_fwd(p, x)
    raise ValueError(kind)


def unet_fwd(p, x, context, time_silu):
    skips = []
    for entry in p["enc"]:
        for layer in entry:
            x = apply_layer(layer, x, context, time_silu)
        skips.append(x)
    for layer in p["bottleneck"]:
        x = apply_layer(layer, x, context, time_silu)
    for entry in p["dec"]:
        x = jnp.concatenate([x, skips.pop()], axis=-1)       # torch.cat(dim=1) in NHWC
        for layer in entry:
            x = apply_layer(layer, x, context, time_silu)
    return x


def diffusion_fwd(params, latent_nchw, context, time):
    # NOTE: intentionally NOT wrapped in one big jax.jit; each op is its own small jitted
    # Pallas program (heavy shape reuse) to keep host compile memory low.
    te = params["time_embedding"]
    t = matmul(time, te["l1"]["w"], b=te["l1"]["b"], act="silu", out_dtype=jnp.float32)
    t = matmul(t, te["l2"]["w"], b=te["l2"]["b"], out_dtype=jnp.float32)
    time_silu = t * jax.nn.sigmoid(t)        # F.silu(time) in every resblock (same input -> hoisted)

    x = jnp.transpose(latent_nchw, (0, 2, 3, 1)).astype(jnp.bfloat16)   # NCHW -> NHWC
    x = unet_fwd(params["unet"], x, context, time_silu)

    fp = params["final"]
    x = group_norm(x, fp["gn"]["g"], fp["gn"]["b"], eps=1e-5, silu=True)
    x = conv2d(x, fp["conv"]["w"], fp["conv"]["b"], ksize=3, stride=1, padding=1)
    return jnp.transpose(x.astype(jnp.float32), (0, 3, 1, 2))           # NHWC -> NCHW


# ----------------------------------------------------------------------------- main

if __name__ == "__main__":
    root = jax.random.PRNGKey(0)
    k_params, k_lat, k_ctx, k_time = jax.random.split(root, 4)

    params = init_diffusion(KeyGen(k_params))

    latent = jax.random.normal(k_lat, (2, 4, 16, 16), jnp.float32)   # NCHW latent
    context = jax.random.normal(k_ctx, (2, 8, 768), jnp.float32)     # (B, seq_ctx, 768)
    time = jax.random.normal(k_time, (1, 320), jnp.float32)          # (1, 320) time input

    out = diffusion_fwd(params, latent, context, time)
    out = jax.block_until_ready(out)

    assert out.shape == (2, 4, 16, 16), out.shape
    assert bool(jnp.all(jnp.isfinite(out)))
    print("KERNEL_OK")
</pallas_src>

<mosaic_0001>
module attributes {stable_mosaic.version = 11 : i64} {
  func.func @_mm_kernel(%arg0: i32, %arg1: i32, %arg2: i32, %arg3: memref<16x320xbf16, #tpu.memory_space<vmem>>, %arg4: memref<320x1280xbf16, #tpu.memory_space<vmem>>, %arg5: memref<1x1280xf32, #tpu.memory_space<vmem>>, %arg6: memref<16x1280xf32, #tpu.memory_space<vmem>>, %arg7: memref<16x1280xf32, #tpu.memory_space<vmem>>) attributes {dimension_semantics = [#tpu.dimension_semantics<parallel>, #tpu.dimension_semantics<parallel>, #tpu.dimension_semantics<arbitrary>], iteration_bounds = array<i64: 1, 1, 1>, scalar_prefetch = 0 : i64, scratch_operands = 1 : i64, tpu.core_type = #tpu.core_type<tc>, window_params = [{transform_indices = @transform_0, window_bounds = array<i64: 16, 320>}, {transform_indices = @transform_1, window_bounds = array<i64: 320, 1280>}, {transform_indices = @transform_2, window_bounds = array<i64: 1, 1280>}, {transform_indices = @transform_3, window_bounds = array<i64: 16, 1280>}]} {
    %c0_i32 = arith.constant 0 : i32
    %0 = arith.cmpi eq, %arg2, %c0_i32 : i32
    %1 = arith.extui %0 : i1 to i32
    %c0_i32_0 = arith.constant 0 : i32
    %2 = arith.cmpi ne, %1, %c0_i32_0 : i32
    scf.if %2 {
      %cst_10 = arith.constant 0.000000e+00 : f32
      %12 = vector.broadcast %cst_10 : f32 to vector<16x1280xf32>
      %c0_11 = arith.constant 0 : index
      %c0_12 = arith.constant 0 : index
      %13 = vector.load %arg7[%c0_11, %c0_12] : memref<16x1280xf32, #tpu.memory_space<vmem>>, vector<16x1280xf32>
      tpu.vector_store %arg7[%c0_11, %c0_12], %12 {strides = array<i32>} : memref<16x1280xf32, #tpu.memory_space<vmem>>, vector<16x1280xf32>,
    } else {
    }
    %c0 = arith.constant 0 : index
    %c0_1 = arith.constant 0 : index
    %3 = vector.load %arg7[%c0, %c0_1] : memref<16x1280xf32, #tpu.memory_space<vmem>>, vector<16x1280xf32>
    %c0_2 = arith.constant 0 : index
    %c0_3 = arith.constant 0 : index
    %4 = vector.load %arg3[%c0_2, %c0_3] : memref<16x320xbf16, #tpu.memory_space<vmem>>, vector<16x320xbf16>
    %c0_4 = arith.constant 0 : index
    %c0_5 = arith.constant 0 : index
    %5 = vector.load %arg4[%c0_4, %c0_5] : memref<320x1280xbf16, #tpu.memory_space<vmem>>, vector<320x1280xbf16>
    %cst = arith.constant dense<0.000000e+00> : vector<16x1280xf32>
    %6 = tpu.matmul %4, %5, %cst {dimension_numbers = #tpu.dot_dimension_numbers<[1], [0], [0], [1], [0, 0, 1, 1], [], []>} : vector<16x320xbf16>, vector<320x1280xbf16>, vector<16x1280xf32> -> vector<16x1280xf32>
    %7 = arith.addf %3, %6 : vector<16x1280xf32>
    %c0_6 = arith.constant 0 : index
    %c0_7 = arith.constant 0 : index
    %8 = vector.load %arg7[%c0_6, %c0_7] : memref<16x1280xf32, #tpu.memory_space<vmem>>, vector<16x1280xf32>
    tpu.vector_store %arg7[%c0_6, %c0_7], %7 {strides = array<i32>} : memref<16x1280xf32, #tpu.memory_space<vmem>>, vector<16x1280xf32>,
    %c0_i32_8 = arith.constant 0 : i32
    %9 = arith.cmpi eq, %arg2, %c0_i32_8 : i32
    %10 = arith.extui %9 : i1 to i32
    %c0_i32_9 = arith.constant 0 : i32
    %11 = arith.cmpi ne, %10, %c0_i32_9 : i32
    scf.if %11 {
      %c0_10 = arith.constant 0 : index
      %c0_11 = arith.constant 0 : index
      %12 = vector.load %arg7[%c0_10, %c0_11] : memref<16x1280xf32, #tpu.memory_space<vmem>>, vector<16x1280xf32>
      %c0_12 = arith.constant 0 : index
      %c0_13 = arith.constant 0 : index
      %13 = vector.load %arg5[%c0_12, %c0_13] : memref<1x1280xf32, #tpu.memory_space<vmem>>, vector<1x1280xf32>
      %14 = vector.broadcast %13 : vector<1x1280xf32> to vector<16x1280xf32>
      %15 = arith.addf %12, %14 : vector<16x1280xf32>
      %16 = arith.negf %15 : vector<16x1280xf32>
      %17 = math.exp %16 : vector<16x1280xf32>
      %cst_14 = arith.constant 1.000000e+00 : f32
      %18 = vector.broadcast %cst_14 : f32 to vector<16x1280xf32>
      %19 = arith.addf %18, %17 : vector<16x1280xf32>
      %20 = arith.divf %18, %19 : vector<16x1280xf32>
      %21 = arith.mulf %15, %20 : vector<16x1280xf32>
      %c0_15 = arith.constant 0 : index
      %c0_16 = arith.constant 0 : index
      %22 = vector.load %arg6[%c0_15, %c0_16] : memref<16x1280xf32, #tpu.memory_space<vmem>>, vector<16x1280xf32>
      tpu.vector_store %arg6[%c0_15, %c0_16], %21 {strides = array<i32>} : memref<16x1280xf32, #tpu.memory_space<vmem>>, vector<16x1280xf32>,
    } else {
    }
    return
  }
  func.func @transform_0(%arg0: i32, %arg1: i32, %arg2: i32) -> (i32, i32) {
    %c0_i32 = arith.constant 0 : i32
    return %arg0, %arg2 : i32, i32
  }
  func.func @transform_1(%arg0: i32, %arg1: i32, %arg2: i32) -> (i32, i32) {
    %c0_i32 = arith.constant 0 : i32
    return %arg2, %arg1 : i32, i32
  }
  func.func @transform_2(%arg0: i32, %arg1: i32, %arg2: i32) -> (i32, i32) {
    %c0_i32 = arith.constant 0 : i32
    %c0_i32_0 = arith.constant 0 : i32
    return %c0_i32, %arg1 : i32, i32
  }
  func.func @transform_3(%arg0: i32, %arg1: i32, %arg2: i32) -> (i32, i32) {
    %c0_i32 = arith.constant 0 : i32
    return %arg0, %arg1 : i32, i32
  }
}

</mosaic_0001>

<bundles_post_ra>
// kernel: matmul.1
= control target key start
LH: loop header
LB: loop body
LE: loop exit
PB: predicated region body
PF: predicated region fallthrough
CT: control target
= control target key end

     0   :  { %8 = vsyncpa [#allocation4], 0  ;;  %s2689_s12 = smov [#allocation3]   ;;  %s2872_s0 = inlined_call_operand.vmem [shape: bf16[16,320], index: 0, kind: input, shape index: {}]   ;;  %s2873_s1 = inlined_call_operand.hbm [shape: bf16[320,1280], index: 1, kind: input, shape index: {}]   ;;  %s2874_s2 = inlined_call_operand.vmem [shape: f32[1,1280], index: 2, kind: input, shape index: {}]   ;;  %s2875_s3 = inlined_call_operand.vmem [shape: f32[16,1280], index: 3, kind: output, shape index: {}]  }
   0x1   :  { %s16_s13 = sshll.u32 %s2689_s12, 4  ;;  %s2665_s16 = scalar_lea.hbm %s2873_s1, 25600  ;;  %s17_s13 = int_to_ptr.vmem [resolvable:$true] %s16_s13 }
   0x2   :  { %p2666_p0 = scmp.ne.s32.totalorder %s2873_s1, %s2665_s16  ;;  %p2669_p1 = scmp.lt.u32.totalorder %s2665_s16, %s2873_s1 }
   0x4   :  { %p2671_p2 = pnand %p2669_p1, %p2666_p0 }
   0x6   :  { %2674 = shalt.err (!%p2671_p2)
}
   0x7   :  { %s2675_s21 = scalar_lea.vmem %s17_s13, 25600  ;;  %p2680_p4 = scmp.lt.s32.totalorder %s17_s13, %s17_s13 }
   0x8   :  { %p2676_p3 = scmp.ne.s32.totalorder %s17_s13, %s2675_s21  ;;  %p2681_p5 = scmp.lt.s32.totalorder %s2675_s21, %s2675_s21 }
   0xa   :  { %p2682_p6 = por %p2681_p5, %p2680_p4 }
   0xc   :  { %p2683_p7 = pnand %p2682_p6, %p2676_p3 }
   0xe   :  { %2686 = shalt.err (!%p2683_p7)
}
   0xf   :  { %s2690_s22 = smov 640   ;;  %s2691_s23 = smov 40  }
  0x10   :  { %22 = dma.hbm_to_vmem [thread:$0]  %s2873_s1, 25600, %s17_s13, [#allocation4], %s2690_s22, %s2690_s22, %s2691_s23  }
  0x11   :  { %2687 = dma.done.wait [#allocation4], 25600  }
  0x12   :  { %2688 = vsyncadd [#allocation4], 4294941696  ;;  %v2692_v0 = vmov 0   ;;  %v2280_v1 = vld [vmem:[#allocation3 + $0x4] ss:$40 sps:$4 sm:$0xff]   ;;  %vm1292_vm0 = vcmask 523264  }
  0x13   :  { %1371 = vmatprep.mubr.bf16.mxu0 %v2692_v0  ;;  %v2282_v2 = vld [vmem:[#allocation3 + $0x504] ss:$40 sps:$4 sm:$0xff]   ;;  %1296 = vmatprep.subr.bf16.mxu1 %v2280_v1  ;;  %v2284_v3 = vld [vmem:[#allocation3] ss:$40 sps:$4 sm:$0xff]   ;;  %v2286_v5 = vld [vmem:[#allocation3 + $0x54] ss:$40 sps:$4 sm:$0xff]  }
  0x14   :  { %v2285_v4 = vld [vmem:[#allocation3 + $0x500] ss:$40 sps:$4 sm:$0xff]   ;;  %1339 = vmatprep.subr.bf16.mxu0 %v2282_v2  ;;  %1297 = vmatpush1.bf16.msra.mxu1 %v2284_v3  ;;  %v2288_v6 = vld [vmem:[#allocation3 + $0x554] ss:$40 sps:$4 sm:$0xff]   ;;  %v2290_v7 = vld [vmem:[#allocation3 + $0x50] ss:$40 sps:$4 sm:$0xff]  }
  0x15   :  { %1340 = vmatpush1.bf16.msra.mxu0 %v2285_v4  ;;  %1298 = vmatprep.subr.bf16.mxu1 %v2286_v5  ;;  %v2291_v8 = vld [vmem:[#allocation3 + $0x550] ss:$40 sps:$4 sm:$0xff]   ;;  %v2292_v9 = vld [vmem:[#allocation3 + $0xa4] ss:$40 sps:$4 sm:$0xff]   ;;  %v2296_v11 = vld [vmem:[#allocation3 + $0xa0] ss:$40 sps:$4 sm:$0xff]  }
  0x16   :  { %1341 = vmatprep.subr.bf16.mxu0 %v2288_v6  ;;  %v2294_v10 = vld [vmem:[#allocation3 + $0x5a4] ss:$40 sps:$4 sm:$0xff]   ;;  %v2297_v12 = vld [vmem:[#allocation3 + $0x5a0] ss:$40 sps:$4 sm:$0xff]   ;;  %v2298_v13 = vld [vmem:[#allocation3 + $0xf4] ss:$40 sps:$4 sm:$0xff]  }
  0x17   :  { %v2300_v14 = vld [vmem:[#allocation3 + $0x5f4] ss:$40 sps:$4 sm:$0xff]   ;;  %v2302_v15 = vld [vmem:[#allocation3 + $0xf0] ss:$40 sps:$4 sm:$0xff]   ;;  %v2304_v17 = vld [vmem:[#allocation3 + $0x144] ss:$40 sps:$4 sm:$0xff]  }
  0x18   :  { %1299 = vmatpush1.bf16.msra.mxu1 %v2290_v7  ;;  %v2303_v16 = vld [vmem:[#allocation3 + $0x5f0] ss:$40 sps:$4 sm:$0xff]   ;;  %v2308_v18 = vld [vmem:[#allocation3 + $0x50c] ss:$40 sps:$4 sm:$0xff]   ;;  %v2309_v21 = vld [vmem:[#allocation3 + $0x140] ss:$40 sps:$4 sm:$0xff]  }
  0x19   :  { %1342 = vmatpush1.bf16.msra.mxu0 %v2291_v8  ;;  %1300 = vmatprep.subr.bf16.mxu1 %v2292_v9  ;;  %v2729_v19 = vld [vmem:[%s2872_s0 + $0x8] ss:$12 sps:$4 sm:$0xff]   ;;  %v2315_v23 = vld [vmem:[#allocation3 + $0x55c] ss:$40 sps:$4 sm:$0xff]   ;;  %v2313_v24 = vld [vmem:[#allocation3 + $0x558] ss:$40 sps:$4 sm:$0xff]  }
  0x1a   :  { %1343 = vmatprep.subr.bf16.mxu0 %v2294_v10  ;;  %v2306_v20 = vld [vmem:[#allocation3 + $0x508] ss:$40 sps:$4 sm:$0xff]   ;;  %v2311_v22 = vld [vmem:[#allocation3 + $0x194] ss:$40 sps:$4 sm:$0xff]   ;;  %v2317_v26 = vld [vmem:[#allocation3 + $0x1e4] ss:$40 sps:$4 sm:$0xff]  }
  0x1b   :  { %v2316_v25 = vld [vmem:[#allocation3 + $0x190] ss:$40 sps:$4 sm:$0xff]   ;;  %v2321_v27 = vld [vmem:[#allocation3 + $0x5ac] ss:$40 sps:$4 sm:$0xff]   ;;  %v2322_v29 = vld [vmem:[#allocation3 + $0x1e0] ss:$40 sps:$4 sm:$0xff]  }
  0x1c   :  { %1301 = vmatpush1.bf16.msra.mxu1 %v2296_v11  ;;  %v2319_v28 = vld [vmem:[#allocation3 + $0x5a8] ss:$40 sps:$4 sm:$0xff]   ;;  %v2323_v30 = vld [vmem:[#allocation3 + $0x234] ss:$40 sps:$4 sm:$0xff]   ;;  %v2325_v32 = vld [vmem:[#allocation3 + $0x5f8] ss:$40 sps:$4 sm:$0xff]  }
  0x1d   :  { %1344 = vmatpush1.bf16.msra.mxu0 %v2297_v12  ;;  %1302 = vmatprep.subr.bf16.mxu1 %v2298_v13  ;;  %v2327_v31 = vld [vmem:[#allocation3 + $0x5fc] ss:$40 sps:$4 sm:$0xff]   ;;  %v2328_v33 = vld [vmem:[#allocation3 + $0x230] ss:$40 sps:$4 sm:$0xff]   ;;  %v2334_v37 = vld [vmem:[#allocation3 + $0x280] ss:$40 sps:$4 sm:$0xff]  }
  0x1e   :  { %1345 = vmatprep.subr.bf16.mxu0 %v2300_v14  ;;  %v2329_v34 = vld [vmem:[#allocation3 + $0x284] ss:$40 sps:$4 sm:$0xff]   ;;  %v2333_v35 = vld [vmem:[#allocation3 + $0x14] ss:$40 sps:$4 sm:$0xff]   ;;  %v2331_v36 = vld [vmem:[#allocation3 + $0x10] ss:$40 sps:$4 sm:$0xff]  }
  0x1f   :  { %v2335_v38 = vld [vmem:[#allocation3 + $0x2d4] ss:$40 sps:$4 sm:$0xff]   ;;  %v2339_v39 = vld [vmem:[#allocation3 + $0x64] ss:$40 sps:$4 sm:$0xff]   ;;  %v2337_v40 = vld [vmem:[#allocation3 + $0x60] ss:$40 sps:$4 sm:$0xff]  }
  0x20   :  { %1303 = vmatpush1.bf16.msra.mxu1 %v2302_v15  ;;  %v2340_v41 = vld [vmem:[#allocation3 + $0x2d0] ss:$40 sps:$4 sm:$0xff]   ;;  %v2341_v42 = vld [vmem:[#allocation3 + $0x324] ss:$40 sps:$4 sm:$0xff]   ;;  %v2345_v43 = vld [vmem:[#allocation3 + $0xb4] ss:$40 sps:$4 sm:$0xff]  }
  0x21   :  { %1346 = vmatpush1.bf16.msra.mxu0 %v2303_v16  ;;  %1304 = vmatprep.subr.bf16.mxu1 %v2304_v17  ;;  %v2343_v44 = vld [vmem:[#allocation3 + $0xb0] ss:$40 sps:$4 sm:$0xff]   ;;  %v2346_v45 = vld [vmem:[#allocation3 + $0x320] ss:$40 sps:$4 sm:$0xff]   ;;  %v2347_v46 = vld [vmem:[#allocation3 + $0x374] ss:$40 sps:$4 sm:$0xff]  }
  0x22   :  { %1425 = vmatprep.subr.bf16.mxu0 %v2308_v18  ;;  %v2351_v47 = vld [vmem:[#allocation3 + $0x104] ss:$40 sps:$4 sm:$0xff]   ;;  %v2349_v48 = vld [vmem:[#allocation3 + $0x100] ss:$40 sps:$4 sm:$0xff]   ;;  %v2352_v49 = vld [vmem:[#allocation3 + $0x370] ss:$40 sps:$4 sm:$0xff]  }
  0x23   :  { %v2353_v50 = vld [vmem:[#allocation3 + $0x3c4] ss:$40 sps:$4 sm:$0xff]   ;;  %v2357_v52 = vld [vmem:[#allocation3 + $0x154] ss:$40 sps:$4 sm:$0xff]   ;;  %v2355_v53 = vld [vmem:[#allocation3 + $0x150] ss:$40 sps:$4 sm:$0xff]  }
  0x24   :  { %2231 = vmatmul.mubr.msk.bf16.vlgmr.msra.gmra.mrb[0].mxu0 %vm1292_vm0, %v2729_v19  ;;  %1305 = vmatpush1.bf16.msra.mxu1 %v2309_v21  ;;  %v2739_v51 = vld [vmem:[%s2872_s0 + $0x4] ss:$12 sps:$4 sm:$0xff]   ;;  %v2358_v54 = vld [vmem:[#allocation3 + $0x3c0] ss:$40 sps:$4 sm:$0xff]   ;;  %v2359_v55 = vld [vmem:[#allocation3 + $0x414] ss:$40 sps:$4 sm:$0xff]  }
  0x25   :  { %1426 = vmatpush1.bf16.msra.mxu0 %v2306_v20  ;;  %1306 = vmatprep.subr.bf16.mxu1 %v2311_v22  ;;  %v2363_v56 = vld [vmem:[#allocation3 + $0x1a4] ss:$40 sps:$4 sm:$0xff]   ;;  %v2361_v57 = vld [vmem:[#allocation3 + $0x1a0] ss:$40 sps:$4 sm:$0xff]   ;;  %v2364_v58 = vld [vmem:[#allocation3 + $0x410] ss:$40 sps:$4 sm:$0xff]  }
  0x26   :  { %1427 = vmatprep.subr.bf16.mxu0 %v2315_v23  ;;  %1457 = vmatprep.mubr.bf16.mxu0 %v2692_v0  ;;  %v2365_v59 = vld [vmem:[#allocation3 + $0x464] ss:$40 sps:$4 sm:$0xff]   ;;  %v2369_v60 = vld [vmem:[#allocation3 + $0x1f4] ss:$40 sps:$4 sm:$0xff]   ;;  %v2367_v61 = vld [vmem:[#allocation3 + $0x1f0] ss:$40 sps:$4 sm:$0xff]  }
  0x27   :  { %1328 = vmatprep.mubr.bf16.mxu1 %v2739_v51  ;;  %v2370_v62 = vld [vmem:[#allocation3 + $0x460] ss:$40 sps:$4 sm:$0xff]   ;;  %v2371_v63 = vld [vmem:[#allocation3 + $0x4b4] ss:$40 sps:$4 sm:$0xff]   ;;  %v2375_v1 = vld [vmem:[#allocation3 + $0x244] ss:$40 sps:$4 sm:$0xff]  }
  0x28   :  { %1307 = vmatpush1.bf16.msra.mxu1 %v2316_v25  ;;  %v2373_v2 = vld [vmem:[#allocation3 + $0x240] ss:$40 sps:$4 sm:$0xff]   ;;  %v2376_v3 = vld [vmem:[#allocation3 + $0x4b0] ss:$40 sps:$4 sm:$0xff]   ;;  %v2382_v4 = vld [vmem:[#allocation3 + $0xc] ss:$40 sps:$4 sm:$0xff]  }
  0x29   :  { %1428 = vmatpush1.bf16.msra.mxu0 %v2313_v24  ;;  %1308 = vmatprep.subr.bf16.mxu1 %v2317_v26  ;;  %v2385_v5 = vld [vmem:[#allocation3 + $0x294] ss:$40 sps:$4 sm:$0xff]   ;;  %v2746_v6 = vld [vmem:[%s2872_s0] ss:$12 sps:$4 sm:$0xff]   ;;  %v2380_v7 = vld [vmem:[#allocation3 + $0x8] ss:$40 sps:$4 sm:$0xff]  }
  0x2a   :  { %1429 = vmatprep.subr.bf16.mxu0 %v2321_v27  ;;  %v2383_v8 = vld [vmem:[#allocation3 + $0x290] ss:$40 sps:$4 sm:$0xff]   ;;  %v2388_v9 = vld [vmem:[#allocation3 + $0x5c] ss:$40 sps:$4 sm:$0xff]   ;;  %v2389_v12 = vld [vmem:[#allocation3 + $0x2e0] ss:$40 sps:$4 sm:$0xff]  }
  0x2b   :  { %v2391_v10 = vld [vmem:[#allocation3 + $0x2e4] ss:$40 sps:$4 sm:$0xff]   ;;  %v2386_v11 = vld [vmem:[#allocation3 + $0x58] ss:$40 sps:$4 sm:$0xff]   ;;  %v2397_v14 = vld [vmem:[#allocation3 + $0x334] ss:$40 sps:$4 sm:$0xff]  }
  0x2c   :  { %1309 = vmatpush1.bf16.msra.mxu1 %v2322_v29  ;;  %v2394_v13 = vld [vmem:[#allocation3 + $0xac] ss:$40 sps:$4 sm:$0xff]   ;;  %v2392_v15 = vld [vmem:[#allocation3 + $0xa8] ss:$40 sps:$4 sm:$0xff]   ;;  %v2400_v17 = vld [vmem:[#allocation3 + $0xfc] ss:$40 sps:$4 sm:$0xff]  }
  0x2d   :  { %1430 = vmatpush1.bf16.msra.mxu0 %v2319_v28  ;;  %1310 = vmatprep.subr.bf16.mxu1 %v2323_v30  ;;  %v2395_v16 = vld [vmem:[#allocation3 + $0x330] ss:$40 sps:$4 sm:$0xff]   ;;  %v2403_v18 = vld [vmem:[#allocation3 + $0x384] ss:$40 sps:$4 sm:$0xff]   ;;  %v2401_v21 = vld [vmem:[#allocation3 + $0x380] ss:$40 sps:$4 sm:$0xff]  }
  0x2e   :  { %1431 = vmatprep.subr.bf16.mxu0 %v2327_v31  ;;  %v2398_v20 = vld [vmem:[#allocation3 + $0xf8] ss:$40 sps:$4 sm:$0xff]   ;;  %v2406_v22 = vld [vmem:[#allocation3 + $0x14c] ss:$40 sps:$4 sm:$0xff]   ;;  %v2404_v24 = vld [vmem:[#allocation3 + $0x148] ss:$40 sps:$4 sm:$0xff]  }
  0x2f   :  { %v2409_v23 = vld [vmem:[#allocation3 + $0x3d4] ss:$40 sps:$4 sm:$0xff]   ;;  %v2407_v25 = vld [vmem:[#allocation3 + $0x3d0] ss:$40 sps:$4 sm:$0xff]   ;;  %v2415_v27 = vld [vmem:[#allocation3 + $0x424] ss:$40 sps:$4 sm:$0xff]  }
  0x30   :  { %1311 = vmatpush1.bf16.msra.mxu1 %v2328_v33  ;;  %v2412_v26 = vld [vmem:[#allocation3 + $0x19c] ss:$40 sps:$4 sm:$0xff]   ;;  %v2410_v28 = vld [vmem:[#allocation3 + $0x198] ss:$40 sps:$4 sm:$0xff]   ;;  %v2418_v30 = vld [vmem:[#allocation3 + $0x1ec] ss:$40 sps:$4 sm:$0xff]  }
  0x31   :  { %1432 = vmatpush1.bf16.msra.mxu0 %v2325_v32  ;;  %1312 = vmatprep.subr.bf16.mxu1 %v2329_v34  ;;  %v2413_v29 = vld [vmem:[#allocation3 + $0x420] ss:$40 sps:$4 sm:$0xff]   ;;  %v2421_v31 = vld [vmem:[#allocation3 + $0x474] ss:$40 sps:$4 sm:$0xff]   ;;  %v2419_v33 = vld [vmem:[#allocation3 + $0x470] ss:$40 sps:$4 sm:$0xff]  }
  0x32   :  { %1468 = vmatprep.subr.bf16.mxu0 %v2333_v35  ;;  %v2416_v32 = vld [vmem:[#allocation3 + $0x1e8] ss:$40 sps:$4 sm:$0xff]   ;;  %v2424_v34 = vld [vmem:[#allocation3 + $0x23c] ss:$40 sps:$4 sm:$0xff]  }
  0x33   :  { %v2427_v35 = vld [vmem:[#allocation3 + $0x4c4] ss:$40 sps:$4 sm:$0xff]  }
  0x34   :  { %2232 = vmatmul.mubr.msk.bf16.vlgmr.msra.gmra.mrb[4].mxu0 %vm1292_vm0, %v2729_v19  ;;  %1313 = vmatpush1.bf16.msra.mxu1 %v2334_v37  ;;  %v2425_v37 = vld [vmem:[#allocation3 + $0x4c0] ss:$40 sps:$4 sm:$0xff]  }
  0x35   :  { %1469 = vmatpush1.bf16.msra.mxu0 %v2331_v36  ;;  %1314 = vmatprep.subr.bf16.mxu1 %v2335_v38  ;;  %v2422_v36 = vld [vmem:[#allocation3 + $0x238] ss:$40 sps:$4 sm:$0xff]   ;;  %v2430_v38 = vld [vmem:[#allocation3 + $0x28c] ss:$40 sps:$4 sm:$0xff]  }
  0x36   :  { %1470 = vmatprep.subr.bf16.mxu0 %v2339_v39  ;;  %1500 = vmatprep.mubr.bf16.mxu0 %v2739_v51  ;;  %v2433_v39 = vld [vmem:[#allocation3 + $0x514] ss:$40 sps:$4 sm:$0xff]  }
  0x38   :  { %1315 = vmatpush1.bf16.msra.mxu1 %v2340_v41  ;;  %v2431_v41 = vld [vmem:[#allocation3 + $0x510] ss:$40 sps:$4 sm:$0xff]  }
  0x39   :  { %1471 = vmatpush1.bf16.msra.mxu0 %v2337_v40  ;;  %1316 = vmatprep.subr.bf16.mxu1 %v2341_v42  ;;  %v2428_v40 = vld [vmem:[#allocation3 + $0x288] ss:$40 sps:$4 sm:$0xff]   ;;  %v2436_v42 = vld [vmem:[#allocation3 + $0x2dc] ss:$40 sps:$4 sm:$0xff]  }
  0x3a   :  { %1472 = vmatprep.subr.bf16.mxu0 %v2345_v43  ;;  %v2439_v43 = vld [vmem:[#allocation3 + $0x564] ss:$40 sps:$4 sm:$0xff]  }
  0x3c   :  { %1317 = vmatpush1.bf16.msra.mxu1 %v2346_v45  ;;  %v2437_v45 = vld [vmem:[#allocation3 + $0x560] ss:$40 sps:$4 sm:$0xff]  }
  0x3d   :  { %1473 = vmatpush1.bf16.msra.mxu0 %v2343_v44  ;;  %1318 = vmatprep.subr.bf16.mxu1 %v2347_v46  ;;  %v2434_v44 = vld [vmem:[#allocation3 + $0x2d8] ss:$40 sps:$4 sm:$0xff]   ;;  %v2442_v46 = vld [vmem:[#allocation3 + $0x32c] ss:$40 sps:$4 sm:$0xff]  }
  0x3e   :  { %1474 = vmatprep.subr.bf16.mxu0 %v2351_v47  ;;  %v2445_v47 = vld [vmem:[#allocation3 + $0x5b4] ss:$40 sps:$4 sm:$0xff]  }
  0x40   :  { %1319 = vmatpush1.bf16.msra.mxu1 %v2352_v49  ;;  %v2443_v49 = vld [vmem:[#allocation3 + $0x5b0] ss:$40 sps:$4 sm:$0xff]  }
  0x41   :  { %1475 = vmatpush1.bf16.msra.mxu0 %v2349_v48  ;;  %1320 = vmatprep.subr.bf16.mxu1 %v2353_v50  ;;  %v2440_v48 = vld [vmem:[#allocation3 + $0x328] ss:$40 sps:$4 sm:$0xff]   ;;  %v2448_v50 = vld [vmem:[#allocation3 + $0x37c] ss:$40 sps:$4 sm:$0xff]  }
  0x42   :  { %1476 = vmatprep.subr.bf16.mxu0 %v2357_v52  ;;  %v2451_v52 = vld [vmem:[#allocation3 + $0x604] ss:$40 sps:$4 sm:$0xff]  }
  0x44   :  { %1321 = vmatpush1.bf16.msra.mxu1 %v2358_v54  ;;  %v2449_v54 = vld [vmem:[#allocation3 + $0x600] ss:$40 sps:$4 sm:$0xff]  }
  0x45   :  { %1477 = vmatpush1.bf16.msra.mxu0 %v2355_v53  ;;  %1322 = vmatprep.subr.bf16.mxu1 %v2359_v55  ;;  %v2446_v53 = vld [vmem:[#allocation3 + $0x378] ss:$40 sps:$4 sm:$0xff]   ;;  %v2454_v55 = vld [vmem:[#allocation3 + $0x3cc] ss:$40 sps:$4 sm:$0xff]  }
  0x46   :  { %1478 = vmatprep.subr.bf16.mxu0 %v2363_v56  ;;  %v2457_v56 = vld [vmem:[#allocation3 + $0x24] ss:$40 sps:$4 sm:$0xff]  }
  0x48   :  { %1323 = vmatpush1.bf16.msra.mxu1 %v2364_v58  ;;  %v2455_v58 = vld [vmem:[#allocation3 + $0x20] ss:$40 sps:$4 sm:$0xff]  }
  0x49   :  { %1479 = vmatpush1.bf16.msra.mxu0 %v2361_v57  ;;  %1324 = vmatprep.subr.bf16.mxu1 %v2365_v59  ;;  %v2452_v57 = vld [vmem:[#allocation3 + $0x3c8] ss:$40 sps:$4 sm:$0xff]   ;;  %v2460_v59 = vld [vmem:[#allocation3 + $0x41c] ss:$40 sps:$4 sm:$0xff]  }
  0x4a   :  { %1480 = vmatprep.subr.bf16.mxu0 %v2369_v60  ;;  %v2463_v60 = vld [vmem:[#allocation3 + $0x74] ss:$40 sps:$4 sm:$0xff]  }
  0x4c   :  { %1325 = vmatpush1.bf16.msra.mxu1 %v2370_v62  ;;  %v2461_v62 = vld [vmem:[#allocation3 + $0x70] ss:$40 sps:$4 sm:$0xff]  }
  0x4d   :  { %1481 = vmatpush1.bf16.msra.mxu0 %v2367_v61  ;;  %1326 = vmatprep.subr.bf16.mxu1 %v2371_v63  ;;  %v2458_v61 = vld [vmem:[#allocation3 + $0x418] ss:$40 sps:$4 sm:$0xff]   ;;  %v2466_v63 = vld [vmem:[#allocation3 + $0x46c] ss:$40 sps:$4 sm:$0xff]  }
  0x4e   :  { %1482 = vmatprep.subr.bf16.mxu0 %v2375_v1  ;;  %v2469_v1 = vld [vmem:[#allocation3 + $0xc4] ss:$40 sps:$4 sm:$0xff]  }
  0x50   :  { %1327 = vmatpush1.bf16.msra.mxu1 %v2376_v3  ;;  %v2467_v3 = vld [vmem:[#allocation3 + $0xc0] ss:$40 sps:$4 sm:$0xff]  }
  0x51   :  { %1483 = vmatpush1.bf16.msra.mxu0 %v2373_v2  ;;  %1382 = vmatprep.subr.bf16.mxu1 %v2382_v4  ;;  %v2464_v2 = vld [vmem:[#allocation3 + $0x468] ss:$40 sps:$4 sm:$0xff]   ;;  %v2472_v4 = vld [vmem:[#allocation3 + $0x4bc] ss:$40 sps:$4 sm:$0xff]  }
  0x52   :  { %1484 = vmatprep.subr.bf16.mxu0 %v2385_v5  ;;  %v2475_v5 = vld [vmem:[#allocation3 + $0x114] ss:$40 sps:$4 sm:$0xff]  }
  0x53   :  { %1329 = vmatmul.mubr.bf16.vlgmr.msra.gmra.mrb[0].mxu1 %v2746_v6 }
  0x54   :  { %1383 = vmatpush1.bf16.msra.mxu1 %v2380_v7  ;;  %1414 = vmatprep.mubr.bf16.mxu1 %v2739_v51  ;;  %v2470_v7 = vld [vmem:[#allocation3 + $0x4b8] ss:$40 sps:$4 sm:$0xff]  }
  0x55   :  { %1485 = vmatpush1.bf16.msra.mxu0 %v2383_v8  ;;  %1384 = vmatprep.subr.bf16.mxu1 %v2388_v9  ;;  %v2478_v8 = vld [vmem:[#allocation3 + $0x1c] ss:$40 sps:$4 sm:$0xff]  }
  0x56   :  { %1486 = vmatprep.subr.bf16.mxu0 %v2391_v10  ;;  %v2481_v9 = vld [vmem:[#allocation3 + $0x164] ss:$40 sps:$4 sm:$0xff]   ;;  %v2476_v10 = vld [vmem:[#allocation3 + $0x18] ss:$40 sps:$4 sm:$0xff]  }
  0x58   :  { %1385 = vmatpush1.bf16.msra.mxu1 %v2386_v11  ;;  %v2479_v11 = vld [vmem:[#allocation3 + $0x160] ss:$40 sps:$4 sm:$0xff]  }
  0x59   :  { %1487 = vmatpush1.bf16.msra.mxu0 %v2389_v12  ;;  %1386 = vmatprep.subr.bf16.mxu1 %v2394_v13  ;;  %v2484_v12 = vld [vmem:[#allocation3 + $0x6c] ss:$40 sps:$4 sm:$0xff]  }
  0x5a   :  { %1488 = vmatprep.subr.bf16.mxu0 %v2397_v14  ;;  %v2487_v13 = vld [vmem:[#allocation3 + $0x1b4] ss:$40 sps:$4 sm:$0xff]   ;;  %v2482_v14 = vld [vmem:[#allocation3 + $0x68] ss:$40 sps:$4 sm:$0xff]  }
  0x5c   :  { %1387 = vmatpush1.bf16.msra.mxu1 %v2392_v15  ;;  %v2485_v15 = vld [vmem:[#allocation3 + $0x1b0] ss:$40 sps:$4 sm:$0xff]  }
  0x5d   :  { %1489 = vmatpush1.bf16.msra.mxu0 %v2395_v16  ;;  %1388 = vmatprep.subr.bf16.mxu1 %v2400_v17  ;;  %v2490_v16 = vld [vmem:[#allocation3 + $0xbc] ss:$40 sps:$4 sm:$0xff]  }
  0x5e   :  { %1490 = vmatprep.subr.bf16.mxu0 %v2403_v18  ;;  %v2493_v17 = vld [vmem:[#allocation3 + $0x204] ss:$40 sps:$4 sm:$0xff]   ;;  %v2488_v18 = vld [vmem:[#allocation3 + $0xb8] ss:$40 sps:$4 sm:$0xff]  }
  0x60   :  { %1389 = vmatpush1.bf16.msra.mxu1 %v2398_v20  ;;  %v2491_v20 = vld [vmem:[#allocation3 + $0x200] ss:$40 sps:$4 sm:$0xff]  }
  0x61   :  { %1491 = vmatpush1.bf16.msra.mxu0 %v2401_v21  ;;  %1390 = vmatprep.subr.bf16.mxu1 %v2406_v22  ;;  %v2496_v21 = vld [vmem:[#allocation3 + $0x10c] ss:$40 sps:$4 sm:$0xff]  }
  0x62   :  { %1492 = vmatprep.subr.bf16.mxu0 %v2409_v23  ;;  %v2499_v22 = vld [vmem:[#allocation3 + $0x254] ss:$40 sps:$4 sm:$0xff]   ;;  %v2494_v23 = vld [vmem:[#allocation3 + $0x108] ss:$40 sps:$4 sm:$0xff]  }
  0x64   :  { %1391 = vmatpush1.bf16.msra.mxu1 %v2404_v24  ;;  %v2497_v24 = vld [vmem:[#allocation3 + $0x250] ss:$40 sps:$4 sm:$0xff]  }
  0x65   :  { %1493 = vmatpush1.bf16.msra.mxu0 %v2407_v25  ;;  %1392 = vmatprep.subr.bf16.mxu1 %v2412_v26  ;;  %v2502_v25 = vld [vmem:[#allocation3 + $0x15c] ss:$40 sps:$4 sm:$0xff]  }
  0x66   :  { %1494 = vmatprep.subr.bf16.mxu0 %v2415_v27  ;;  %v2505_v26 = vld [vmem:[#allocation3 + $0x2a4] ss:$40 sps:$4 sm:$0xff]   ;;  %v2500_v27 = vld [vmem:[#allocation3 + $0x158] ss:$40 sps:$4 sm:$0xff]  }
  0x68   :  { %1393 = vmatpush1.bf16.msra.mxu1 %v2410_v28  ;;  %v2508_v28 = vld [vmem:[#allocation3 + $0x1ac] ss:$40 sps:$4 sm:$0xff]  }
  0x69   :  { %1495 = vmatpush1.bf16.msra.mxu0 %v2413_v29  ;;  %1394 = vmatprep.subr.bf16.mxu1 %v2418_v30  ;;  %v2511_v29 = vld [vmem:[#allocation3 + $0x2f4] ss:$40 sps:$4 sm:$0xff]   ;;  %v2506_v30 = vld [vmem:[#allocation3 + $0x1a8] ss:$40 sps:$4 sm:$0xff]  }
  0x6a   :  { %1496 = vmatprep.subr.bf16.mxu0 %v2421_v31  ;;  %v2509_v31 = vld [vmem:[#allocation3 + $0x2f0] ss:$40 sps:$4 sm:$0xff]  }
  0x6c   :  { %1395 = vmatpush1.bf16.msra.mxu1 %v2416_v32  ;;  %v2514_v32 = vld [vmem:[#allocation3 + $0x1fc] ss:$40 sps:$4 sm:$0xff]  }
  0x6d   :  { %1497 = vmatpush1.bf16.msra.mxu0 %v2419_v33  ;;  %1396 = vmatprep.subr.bf16.mxu1 %v2424_v34  ;;  %v2517_v33 = vld [vmem:[#allocation3 + $0x344] ss:$40 sps:$4 sm:$0xff]   ;;  %v2512_v34 = vld [vmem:[#allocation3 + $0x1f8] ss:$40 sps:$4 sm:$0xff]  }
  0x6e   :  { %1498 = vmatprep.subr.bf16.mxu0 %v2427_v35  ;;  %v2515_v35 = vld [vmem:[#allocation3 + $0x340] ss:$40 sps:$4 sm:$0xff]  }
  0x70   :  { %1397 = vmatpush1.bf16.msra.mxu1 %v2422_v36  ;;  %v2520_v36 = vld [vmem:[#allocation3 + $0x24c] ss:$40 sps:$4 sm:$0xff]  }
  0x71   :  { %1499 = vmatpush1.bf16.msra.mxu0 %v2425_v37  ;;  %1398 = vmatprep.subr.bf16.mxu1 %v2430_v38  ;;  %v2523_v37 = vld [vmem:[#allocation3 + $0x394] ss:$40 sps:$4 sm:$0xff]   ;;  %v2518_v38 = vld [vmem:[#allocation3 + $0x248] ss:$40 sps:$4 sm:$0xff]  }
  0x72   :  { %1511 = vmatprep.subr.bf16.mxu0 %v2433_v39  ;;  %v2521_v39 = vld [vmem:[#allocation3 + $0x390] ss:$40 sps:$4 sm:$0xff]  }
  0x74   :  { %1501 = vmatmul.mubr.bf16.vlgmr.msra.gmra.mrb[8].mxu0 %v2746_v6  ;;  %1399 = vmatpush1.bf16.msra.mxu1 %v2428_v40  ;;  %v2526_v40 = vld [vmem:[#allocation3 + $0x29c] ss:$40 sps:$4 sm:$0xff]  }
  0x75   :  { %1512 = vmatpush1.bf16.msra.mxu0 %v2431_v41  ;;  %1400 = vmatprep.subr.bf16.mxu1 %v2436_v42  ;;  %v2529_v41 = vld [vmem:[#allocation3 + $0x3e4] ss:$40 sps:$4 sm:$0xff]   ;;  %v2524_v42 = vld [vmem:[#allocation3 + $0x298] ss:$40 sps:$4 sm:$0xff]  }
  0x76   :  { %1513 = vmatprep.subr.bf16.mxu0 %v2439_v43  ;;  %1543 = vmatprep.mubr.bf16.mxu0 %v2692_v0  ;;  %v2527_v43 = vld [vmem:[#allocation3 + $0x3e0] ss:$40 sps:$4 sm:$0xff]  }
  0x78   :  { %1401 = vmatpush1.bf16.msra.mxu1 %v2434_v44  ;;  %v2532_v44 = vld [vmem:[#allocation3 + $0x2ec] ss:$40 sps:$4 sm:$0xff]  }
  0x79   :  { %1514 = vmatpush1.bf16.msra.mxu0 %v2437_v45  ;;  %1402 = vmatprep.subr.bf16.mxu1 %v2442_v46  ;;  %v2535_v45 = vld [vmem:[#allocation3 + $0x434] ss:$40 sps:$4 sm:$0xff]   ;;  %v2530_v46 = vld [vmem:[#allocation3 + $0x2e8] ss:$40 sps:$4 sm:$0xff]  }
  0x7a   :  { %1515 = vmatprep.subr.bf16.mxu0 %v2445_v47  ;;  %v2533_v47 = vld [vmem:[#allocation3 + $0x430] ss:$40 sps:$4 sm:$0xff]  }
  0x7c   :  { %1403 = vmatpush1.bf16.msra.mxu1 %v2440_v48  ;;  %v2538_v48 = vld [vmem:[#allocation3 + $0x33c] ss:$40 sps:$4 sm:$0xff]  }
  0x7d   :  { %1516 = vmatpush1.bf16.msra.mxu0 %v2443_v49  ;;  %1404 = vmatprep.subr.bf16.mxu1 %v2448_v50  ;;  %v2541_v49 = vld [vmem:[#allocation3 + $0x484] ss:$40 sps:$4 sm:$0xff]   ;;  %v2536_v50 = vld [vmem:[#allocation3 + $0x338] ss:$40 sps:$4 sm:$0xff]  }
  0x7e   :  { %1517 = vmatprep.subr.bf16.mxu0 %v2451_v52  ;;  %v2539_v52 = vld [vmem:[#allocation3 + $0x480] ss:$40 sps:$4 sm:$0xff]  }
  0x80   :  { %1405 = vmatpush1.bf16.msra.mxu1 %v2446_v53  ;;  %v2544_v53 = vld [vmem:[#allocation3 + $0x38c] ss:$40 sps:$4 sm:$0xff]  }
  0x81   :  { %1518 = vmatpush1.bf16.msra.mxu0 %v2449_v54  ;;  %1406 = vmatprep.subr.bf16.mxu1 %v2454_v55  ;;  %v2547_v54 = vld [vmem:[#allocation3 + $0x4d4] ss:$40 sps:$4 sm:$0xff]   ;;  %v2542_v55 = vld [vmem:[#allocation3 + $0x388] ss:$40 sps:$4 sm:$0xff]  }
  0x82   :  { %1640 = vmatprep.subr.bf16.mxu0 %v2457_v56  ;;  %v2545_v56 = vld [vmem:[#allocation3 + $0x4d0] ss:$40 sps:$4 sm:$0xff]  }
  0x84   :  { %2233 = vmatmul.mubr.msk.bf16.vlgmr.msra.gmra.mrb[8].mxu0 %vm1292_vm0, %v2729_v19  ;;  %1407 = vmatpush1.bf16.msra.mxu1 %v2452_v57  ;;  %v2473_v19 = vld [vmem:[#allocation3 + $0x110] ss:$40 sps:$4 sm:$0xff]   ;;  %v2550_v57 = vld [vmem:[#allocation3 + $0x3dc] ss:$40 sps:$4 sm:$0xff]  }
  0x85   :  { %1641 = vmatpush1.bf16.msra.mxu0 %v2455_v58  ;;  %1408 = vmatprep.subr.bf16.mxu1 %v2460_v59  ;;  %v2553_v58 = vld [vmem:[#allocation3 + $0x524] ss:$40 sps:$4 sm:$0xff]   ;;  %v2548_v59 = vld [vmem:[#allocation3 + $0x3d8] ss:$40 sps:$4 sm:$0xff]  }
  0x86   :  { %1642 = vmatprep.subr.bf16.mxu0 %v2463_v60  ;;  %1672 = vmatprep.mubr.bf16.mxu0 %v2739_v51  ;;  %v2551_v60 = vld [vmem:[#allocation3 + $0x520] ss:$40 sps:$4 sm:$0xff]  }
  0x88   :  { %1409 = vmatpush1.bf16.msra.mxu1 %v2458_v61  ;;  %v2556_v61 = vld [vmem:[#allocation3 + $0x42c] ss:$40 sps:$4 sm:$0xff]  }
  0x89   :  { %1643 = vmatpush1.bf16.msra.mxu0 %v2461_v62  ;;  %1410 = vmatprep.subr.bf16.mxu1 %v2466_v63  ;;  %v2559_v62 = vld [vmem:[#allocation3 + $0x574] ss:$40 sps:$4 sm:$0xff]   ;;  %v2554_v63 = vld [vmem:[#allocation3 + $0x428] ss:$40 sps:$4 sm:$0xff]  }
  0x8a   :  { %1644 = vmatprep.subr.bf16.mxu0 %v2469_v1  ;;  %v2557_v1 = vld [vmem:[#allocation3 + $0x570] ss:$40 sps:$4 sm:$0xff]  }
  0x8c   :  { %1411 = vmatpush1.bf16.msra.mxu1 %v2464_v2  ;;  %v2562_v2 = vld [vmem:[#allocation3 + $0x47c] ss:$40 sps:$4 sm:$0xff]  }
  0x8d   :  { %1645 = vmatpush1.bf16.msra.mxu0 %v2467_v3  ;;  %1412 = vmatprep.subr.bf16.mxu1 %v2472_v4  ;;  %v2565_v3 = vld [vmem:[#allocation3 + $0x5c4] ss:$40 sps:$4 sm:$0xff]   ;;  %v2560_v4 = vld [vmem:[#allocation3 + $0x478] ss:$40 sps:$4 sm:$0xff]  }
  0x8e   :  { %1646 = vmatprep.subr.bf16.mxu0 %v2475_v5  ;;  %v2563_v5 = vld [vmem:[#allocation3 + $0x5c0] ss:$40 sps:$4 sm:$0xff]  }
  0x90   :  { %1413 = vmatpush1.bf16.msra.mxu1 %v2470_v7  ;;  %v2568_v7 = vld [vmem:[#allocation3 + $0x4cc] ss:$40 sps:$4 sm:$0xff]  }
  0x91   :  { %1647 = vmatpush1.bf16.msra.mxu0 %v2473_v19  ;;  %1554 = vmatprep.subr.bf16.mxu1 %v2478_v8  ;;  %v2571_v19 = vld [vmem:[#allocation3 + $0x614] ss:$40 sps:$4 sm:$0xff]   ;;  %v2566_v8 = vld [vmem:[#allocation3 + $0x4c8] ss:$40 sps:$4 sm:$0xff]  }
  0x92   :  { %1648 = vmatprep.subr.bf16.mxu0 %v2481_v9  ;;  %v2569_v9 = vld [vmem:[#allocation3 + $0x610] ss:$40 sps:$4 sm:$0xff]  }
  0x93   :  { %1415 = vmatmul.mubr.bf16.vlgmr.msra.gmra.mrb[4].mxu1 %v2746_v6 }
  0x94   :  { %1555 = vmatpush1.bf16.msra.mxu1 %v2476_v10  ;;  %1586 = vmatprep.mubr.bf16.mxu1 %v2739_v51  ;;  %v2503_v51 = vld [vmem:[#allocation3 + $0x2a0] ss:$40 sps:$4 sm:$0xff]   ;;  %v2574_v10 = vld [vmem:[#allocation3 + $0x51c] ss:$40 sps:$4 sm:$0xff]  }
  0x95   :  { %1649 = vmatpush1.bf16.msra.mxu0 %v2479_v11  ;;  %1556 = vmatprep.subr.bf16.mxu1 %v2484_v12  ;;  %v2572_v11 = vld [vmem:[#allocation3 + $0x518] ss:$40 sps:$4 sm:$0xff]   ;;  %v2577_v12 = vld [vmem:[#allocation3 + $0x56c] ss:$40 sps:$4 sm:$0xff]  }
  0x96   :  { %1650 = vmatprep.subr.bf16.mxu0 %v2487_v13  ;;  %v2664_v13 = vld [vmem:[%s2872_s0 + $0x8] ss:$12 sps:$4 sm:$0xff]  }
  0x98   :  { %1557 = vmatpush1.bf16.msra.mxu1 %v2482_v14  ;;  %v2575_v14 = vld [vmem:[#allocation3 + $0x568] ss:$40 sps:$4 sm:$0xff]  }
  0x99   :  { %1651 = vmatpush1.bf16.msra.mxu0 %v2485_v15  ;;  %1558 = vmatprep.subr.bf16.mxu1 %v2490_v16  ;;  %v2580_v15 = vld [vmem:[#allocation3 + $0x5bc] ss:$40 sps:$4 sm:$0xff]   ;;  %v2578_v16 = vld [vmem:[#allocation3 + $0x5b8] ss:$40 sps:$4 sm:$0xff]  }
  0x9a   :  { %1652 = vmatprep.subr.bf16.mxu0 %v2493_v17  ;;  %v2583_v17 = vld [vmem:[#allocation3 + $0x60c] ss:$40 sps:$4 sm:$0xff]  }
  0x9c   :  { %1559 = vmatpush1.bf16.msra.mxu1 %v2488_v18  ;;  %v2581_v18 = vld [vmem:[#allocation3 + $0x608] ss:$40 sps:$4 sm:$0xff]  }
  0x9d   :  { %1653 = vmatpush1.bf16.msra.mxu0 %v2491_v20  ;;  %1560 = vmatprep.subr.bf16.mxu1 %v2496_v21 }
  0x9e   :  { %1654 = vmatprep.subr.bf16.mxu0 %v2499_v22 }
  0xa0   :  { %1561 = vmatpush1.bf16.msra.mxu1 %v2494_v23 }
  0xa1   :  { %1655 = vmatpush1.bf16.msra.mxu0 %v2497_v24  ;;  %1562 = vmatprep.subr.bf16.mxu1 %v2502_v25 }
  0xa2   :  { %1656 = vmatprep.subr.bf16.mxu0 %v2505_v26  ;;  %v1793_v26 = vlaneseq }
  0xa4   :  { %1563 = vmatpush1.bf16.msra.mxu1 %v2500_v27  ;;  %v2774_v27 = vshrl.u32 %v1793_v26, 7 }
  0xa5   :  { %1657 = vmatpush1.bf16.msra.mxu0 %v2503_v51  ;;  %1564 = vmatprep.subr.bf16.mxu1 %v2508_v28  ;;  %v2780_v28 = vld [vmem:[%s2874_s2] sm:$0xff] }
  0xa6   :  { %1658 = vmatprep.subr.bf16.mxu0 %v2511_v29  ;;  %v1795_v51 = vsub.s32 0, %v2774_v27  ;;  %v1799_v29 = vsub.s32 1, %v2774_v27 }
  0xa8   :  { %1565 = vmatpush1.bf16.msra.mxu1 %v2506_v30  ;;  %v1796_v30 = vrot.slane %v2780_v28, %v1795_v51 }
  0xa9   :  { %1659 = vmatpush1.bf16.msra.mxu0 %v2509_v31  ;;  %1566 = vmatprep.subr.bf16.mxu1 %v2514_v32  ;;  %v1800_v32 = vrot.slane %v2780_v28, %v1799_v29 }
  0xaa   :  { %1660 = vmatprep.subr.bf16.mxu0 %v2517_v33 }
  0xac   :  { %1567 = vmatpush1.bf16.msra.mxu1 %v2512_v34 }
  0xad   :  { %1661 = vmatpush1.bf16.msra.mxu0 %v2515_v35  ;;  %1568 = vmatprep.subr.bf16.mxu1 %v2520_v36 }
  0xae   :  { %1662 = vmatprep.subr.bf16.mxu0 %v2523_v37 }
  0xb0   :  { %1569 = vmatpush1.bf16.msra.mxu1 %v2518_v38 }
  0xb1   :  { %1663 = vmatpush1.bf16.msra.mxu0 %v2521_v39  ;;  %1570 = vmatprep.subr.bf16.mxu1 %v2526_v40 }
  0xb2   :  { %1664 = vmatprep.subr.bf16.mxu0 %v2529_v41 }
  0xb4   :  { %1571 = vmatpush1.bf16.msra.mxu1 %v2524_v42 }
  0xb5   :  { %1665 = vmatpush1.bf16.msra.mxu0 %v2527_v43  ;;  %1572 = vmatprep.subr.bf16.mxu1 %v2532_v44 }
  0xb6   :  { %1666 = vmatprep.subr.bf16.mxu0 %v2535_v45 }
  0xb8   :  { %1573 = vmatpush1.bf16.msra.mxu1 %v2530_v46 }
  0xb9   :  { %1667 = vmatpush1.bf16.msra.mxu0 %v2533_v47  ;;  %1574 = vmatprep.subr.bf16.mxu1 %v2538_v48 }
  0xba   :  { %1668 = vmatprep.subr.bf16.mxu0 %v2541_v49 }
  0xbc   :  { %1575 = vmatpush1.bf16.msra.mxu1 %v2536_v50 }
  0xbd   :  { %1669 = vmatpush1.bf16.msra.mxu0 %v2539_v52  ;;  %1576 = vmatprep.subr.bf16.mxu1 %v2544_v53 }
  0xbe   :  { %1670 = vmatprep.subr.bf16.mxu0 %v2547_v54 }
  0xc0   :  { %1577 = vmatpush1.bf16.msra.mxu1 %v2542_v55 }
  0xc1   :  { %1671 = vmatpush1.bf16.msra.mxu0 %v2545_v56  ;;  %1578 = vmatprep.subr.bf16.mxu1 %v2550_v57 }
  0xc2   :  { %1683 = vmatprep.subr.bf16.mxu0 %v2553_v58 }
  0xc4   :  { %1673 = vmatmul.mubr.bf16.vlgmr.msra.gmra.mrb[12].mxu0 %v2746_v6  ;;  %1579 = vmatpush1.bf16.msra.mxu1 %v2548_v59 }
  0xc5   :  { %1684 = vmatpush1.bf16.msra.mxu0 %v2551_v60  ;;  %1580 = vmatprep.subr.bf16.mxu1 %v2556_v61 }
  0xc6   :  { %1685 = vmatprep.subr.bf16.mxu0 %v2559_v62  ;;  %1715 = vmatprep.mubr.bf16.mxu0 %v2692_v0 }
  0xc8   :  { %1581 = vmatpush1.bf16.msra.mxu1 %v2554_v63 }
  0xc9   :  { %1686 = vmatpush1.bf16.msra.mxu0 %v2557_v1  ;;  %1582 = vmatprep.subr.bf16.mxu1 %v2562_v2  ;;  %v1811_v2 = vsub.s32 4, %v2774_v27 }
  0xca   :  { %1687 = vmatprep.subr.bf16.mxu0 %v2565_v3  ;;  %v1815_v3 = vsub.s32 5, %v2774_v27 }
  0xcc   :  { %1583 = vmatpush1.bf16.msra.mxu1 %v2560_v4  ;;  %v1812_v4 = vrot.slane %v2780_v28, %v1811_v2 }
  0xcd   :  { %1688 = vmatpush1.bf16.msra.mxu0 %v2563_v5  ;;  %1584 = vmatprep.subr.bf16.mxu1 %v2568_v7  ;;  %v1816_v5 = vrot.slane %v2780_v28, %v1815_v3 }
  0xce   :  { %1689 = vmatprep.subr.bf16.mxu0 %v2571_v19 }
  0xd0   :  { %1585 = vmatpush1.bf16.msra.mxu1 %v2566_v8 }
  0xd1   :  { %1690 = vmatpush1.bf16.msra.mxu0 %v2569_v9  ;;  %1597 = vmatprep.subr.bf16.mxu1 %v2574_v10 }
  0xd3   :  { %1587 = vmatmul.mubr.bf16.vlgmr.msra.gmra.mrb[8].mxu1 %v2746_v6 }
  0xd4   :  { %2235 = vmatmul.mubr.msk.bf16.vlgmr.msra.gmra.mrb[12].mxu0 %vm1292_vm0, %v2664_v13  ;;  %1598 = vmatpush1.bf16.msra.mxu1 %v2572_v11 }
  0xd5   :  { %1629 = vmatprep.mubr.bf16.mxu1 %v2692_v0  ;;  %1599 = vmatprep.subr.bf16.mxu1 %v2577_v12 }
  0xd8   :  { %1600 = vmatpush1.bf16.msra.mxu1 %v2575_v14 }
  0xd9   :  { %1601 = vmatprep.subr.bf16.mxu1 %v2580_v15 }
  0xdc   :  { %1602 = vmatpush1.bf16.msra.mxu1 %v2578_v16 }
  0xdd   :  { %1603 = vmatprep.subr.bf16.mxu1 %v2583_v17 }
  0xe0   :  { %1604 = vmatpush1.bf16.msra.mxu1 %v2581_v18  ;;  %v1803_v18 = vsub.s32 2, %v2774_v27 }
  0xe3   :  { %2234 = vmatmul.mubr.msk.bf16.vlgmr.msra.gmra.mrb[8].mxu1 %vm1292_vm0, %v2664_v13 }
  0xf7   :  { %v1373_v20 = vpop.f32.mrb[0].mxu0 }
  0xf8   :  { %v1375_v21 = vpop.f32.mrb[1].mxu0 }
  0xf9   :  { %v1377_v22 = vpop.f32.mrb[2].mxu0 }
  0xfa   :  { %v1379_v6 = vpop.f32.mrb[3].mxu0 }
 0x107   :  { %v2766_v23 = vpop.f32.mrb[4].mxu0 }
 0x108   :  { %v2768_v24 = vpop.f32.mrb[5].mxu0 }
 0x109   :  { %v2770_v0 = vpop.f32.mrb[6].mxu0 }
 0x10a   :  { %v2772_v25 = vpop.f32.mrb[7].mxu0 }
 0x126   :  { %v1330_v31 = vpop.f32.mrb[0].mxu1 }
 0x127   :  { %v1374_v33 = vadd.f32 %v1373_v20, %v1330_v31  ;;  %v1332_v34 = vpop.f32.mrb[1].mxu1  ;;  %v1807_v20 = vsub.s32 3, %v2774_v27 }
 0x128   :  { %v1376_v35 = vadd.f32 %v1375_v21, %v1332_v34  ;;  %v1334_v36 = vpop.f32.mrb[2].mxu1 }
 0x129   :  { %v1843_v37 = vadd.f32 %v1796_v30, %v1374_v33  ;;  %v1378_v38 = vadd.f32 %v1377_v22, %v1334_v36  ;;  %v1336_v39 = vpop.f32.mrb[3].mxu1  ;;  %v1804_v22 = vrot.slane %v2780_v28, %v1803_v18  ;;  %v1808_v31 = vrot.slane %v2780_v28, %v1807_v20 }
 0x12a   :  { %v1844_v40 = vadd.f32 %v1800_v32, %v1376_v35  ;;  %v1380_v41 = vadd.f32 %v1379_v6, %v1336_v39 }
 0x12b   :  { %v2236_v42 = vmul.f32 -1.442695, %v1843_v37  ;;  %v1853_v43 = vadd.f32 %v1796_v30, %v1378_v38 }
 0x12c   :  { %v2237_v44 = vmul.f32 -1.442695, %v1844_v40  ;;  %v1854_v45 = vadd.f32 %v1800_v32, %v1380_v41 }
 0x12d   :  { %2584 = vpow2.f32 %v2236_v42  ;;  %v2246_v46 = vmul.f32 -1.442695, %v1853_v43 }
 0x12e   :  { %2586 = vpow2.f32 %v2237_v44  ;;  %v2247_v47 = vmul.f32 -1.442695, %v1854_v45 }
 0x12f   :  { %2588 = vpow2.f32 %v2246_v46 }
 0x130   :  { %2590 = vpow2.f32 %v2247_v47 }
 0x137   :  { %v2585_v48 = vpop.eup %2584 }
 0x138   :  { %v2587_v49 = vpop.eup %2586  ;;  %v1923_v50 = vadd.f32 1.0, %v2585_v48 }
 0x139   :  { %v2589_v52 = vpop.eup %2588  ;;  %v1924_v53 = vadd.f32 1.0, %v2587_v49 }
 0x13a   :  { %v2591_v54 = vpop.eup %2590  ;;  %2592 = vrcp.f32 %v1923_v50  ;;  %v1933_v55 = vadd.f32 1.0, %v2589_v52 }
 0x13b   :  { %2594 = vrcp.f32 %v1924_v53  ;;  %v1934_v56 = vadd.f32 1.0, %v2591_v54 }
 0x13c   :  { %2596 = vrcp.f32 %v1933_v55 }
 0x13d   :  { %2598 = vrcp.f32 %v1934_v56 }
 0x144   :  { %v2593_v57 = vpop.eup %2592 }
 0x145   :  { %v2595_v58 = vpop.eup %2594  ;;  %v1983_v59 = vmul.f32 %v2593_v57, %v1843_v37 }
 0x146   :  { %v2597_v60 = vpop.eup %2596  ;;  %v1984_v61 = vmul.f32 %v2595_v58, %v1844_v40 }
 0x147   :  { %v2599_v62 = vpop.eup %2598  ;;  %2003 = vst [vmem:[%s2875_s3] sm:$0xff] %v1983_v59  ;;  %v1993_v63 = vmul.f32 %v2597_v60, %v1853_v43 }
 0x148   :  { %2004 = vst [vmem:[%s2875_s3 + $0x8] sm:$0xff] %v1984_v61  ;;  %v1994_v1 = vmul.f32 %v2599_v62, %v1854_v45 }
 0x149   :  { %2013 = vst [vmem:[%s2875_s3 + $0x50] sm:$0xff] %v1993_v63 }
 0x14a   :  { %2014 = vst [vmem:[%s2875_s3 + $0x58] sm:$0xff] %v1994_v1 }
 0x157   :  { %v1545_v7 = vpop.f32.mrb[8].mxu0 }
 0x158   :  { %v1847_v19 = vadd.f32 %v1812_v4, %v1545_v7  ;;  %v1547_v8 = vpop.f32.mrb[9].mxu0 }
 0x159   :  { %v1848_v9 = vadd.f32 %v1816_v5, %v1547_v8  ;;  %v1549_v10 = vpop.f32.mrb[10].mxu0 }
 0x15a   :  { %v2240_v11 = vmul.f32 -1.442695, %v1847_v19  ;;  %v1857_v12 = vadd.f32 %v1812_v4, %v1549_v10  ;;  %v1551_v13 = vpop.f32.mrb[11].mxu0  ;;  %v1790_v10 = vld [vmem:[%s2874_s2 + $0x8] sm:$0x3] }
 0x15b   :  { %v2241_v14 = vmul.f32 -1.442695, %v1848_v9  ;;  %v1858_v15 = vadd.f32 %v1816_v5, %v1551_v13 }
 0x15c   :  { %2600 = vpow2.f32 %v2240_v11  ;;  %v2250_v16 = vmul.f32 -1.442695, %v1857_v12  ;;  %v1828_v11 = vrot.slane %v1790_v10, %v1795_v51  ;;  %v1819_v51 = vsub.s32 6, %v2774_v27 }
 0x15d   :  { %2602 = vpow2.f32 %v2241_v14  ;;  %v2251_v17 = vmul.f32 -1.442695, %v1858_v15 }
 0x15e   :  { %2604 = vpow2.f32 %v2250_v16 }
 0x15f   :  { %2606 = vpow2.f32 %v2251_v17 }
 0x166   :  { %v2601_v21 = vpop.eup %2600  ;;  %v1416_v30 = vpop.f32.mrb[4].mxu1 }
 0x167   :  { %v2603_v6 = vpop.eup %2602  ;;  %v1927_v26 = vadd.f32 1.0, %v2601_v21  ;;  %v1460_v34 = vadd.f32 %v2766_v23, %v1416_v30  ;;  %v1418_v35 = vpop.f32.mrb[5].mxu1 }
 0x168   :  { %v2605_v32 = vpop.eup %2604  ;;  %v1928_v33 = vadd.f32 1.0, %v2603_v6  ;;  %v1462_v38 = vadd.f32 %v2768_v24, %v1418_v35  ;;  %v1420_v39 = vpop.f32.mrb[6].mxu1 }
 0x169   :  { %v2607_v36 = vpop.eup %2606  ;;  %2608 = vrcp.f32 %v1927_v26  ;;  %v1937_v37 = vadd.f32 1.0, %v2605_v32  ;;  %v1845_v41 = vadd.f32 %v1804_v22, %v1460_v34  ;;  %v1464_v42 = vadd.f32 %v2770_v0, %v1420_v39  ;;  %v1422_v43 = vpop.f32.mrb[7].mxu1 }
 0x16a   :  { %2610 = vrcp.f32 %v1928_v33  ;;  %v1938_v40 = vadd.f32 1.0, %v2607_v36  ;;  %v1846_v44 = vadd.f32 %v1808_v31, %v1462_v38  ;;  %v1466_v45 = vadd.f32 %v2772_v25, %v1422_v43 }
 0x16b   :  { %2612 = vrcp.f32 %v1937_v37  ;;  %v2238_v46 = vmul.f32 -1.442695, %v1845_v41  ;;  %v1855_v23 = vadd.f32 %v1804_v22, %v1464_v42 }
 0x16c   :  { %2614 = vrcp.f32 %v1938_v40  ;;  %v2239_v47 = vmul.f32 -1.442695, %v1846_v44  ;;  %v1856_v48 = vadd.f32 %v1808_v31, %v1466_v45  ;;  %v1820_v31 = vrot.slane %v2780_v28, %v1819_v51 }
 0x16d   :  { %2616 = vpow2.f32 %v2238_v46  ;;  %v2248_v49 = vmul.f32 -1.442695, %v1855_v23 }
 0x16e   :  { %2618 = vpow2.f32 %v2239_v47  ;;  %v2249_v24 = vmul.f32 -1.442695, %v1856_v48 }
 0x16f   :  { %2620 = vpow2.f32 %v2248_v49 }
 0x170   :  { %2622 = vpow2.f32 %v2249_v24 }
 0x173   :  { %v2609_v50 = vpop.eup %2608 }
 0x174   :  { %v2611_v52 = vpop.eup %2610  ;;  %v1987_v53 = vmul.f32 %v2609_v50, %v1847_v19 }
 0x175   :  { %v2613_v0 = vpop.eup %2612  ;;  %v1988_v54 = vmul.f32 %v2611_v52, %v1848_v9 }
 0x176   :  { %v2615_v55 = vpop.eup %2614  ;;  %2007 = vst [vmem:[%s2875_s3 + $0x20] sm:$0xff] %v1987_v53  ;;  %v1997_v25 = vmul.f32 %v2613_v0, %v1857_v12  ;;  %v1832_v12 = vrot.slane %v1790_v10, %v1799_v29  ;;  %v1823_v29 = vsub.s32 7, %v2774_v27 }
 0x177   :  { %2008 = vst [vmem:[%s2875_s3 + $0x28] sm:$0xff] %v1988_v54  ;;  %v1998_v56 = vmul.f32 %v2615_v55, %v1858_v15  ;;  %v2617_v57 = vpop.eup %2616 }
 0x178   :  { %2017 = vst [vmem:[%s2875_s3 + $0x70] sm:$0xff] %v1997_v25  ;;  %v2619_v58 = vpop.eup %2618  ;;  %v1925_v59 = vadd.f32 1.0, %v2617_v57  ;;  %v1824_v32 = vrot.slane %v2780_v28, %v1823_v29 }
 0x179   :  { %2018 = vst [vmem:[%s2875_s3 + $0x78] sm:$0xff] %v1998_v56  ;;  %v2621_v60 = vpop.eup %2620  ;;  %v1926_v61 = vadd.f32 1.0, %v2619_v58 }
 0x17a   :  { %v2623_v62 = vpop.eup %2622  ;;  %2624 = vrcp.f32 %v1925_v59  ;;  %v1935_v63 = vadd.f32 1.0, %v2621_v60 }
 0x17b   :  { %2626 = vrcp.f32 %v1926_v61  ;;  %v1936_v1 = vadd.f32 1.0, %v2623_v62 }
 0x17c   :  { %2628 = vrcp.f32 %v1935_v63 }
 0x17d   :  { %2630 = vrcp.f32 %v1936_v1 }
 0x184   :  { %v2625_v2 = vpop.eup %2624 }
 0x185   :  { %v2627_v3 = vpop.eup %2626  ;;  %v1985_v4 = vmul.f32 %v2625_v2, %v1845_v41 }
 0x186   :  { %v2629_v5 = vpop.eup %2628  ;;  %v1986_v7 = vmul.f32 %v2627_v3, %v1846_v44 }
 0x187   :  { %v2631_v19 = vpop.eup %2630  ;;  %2005 = vst [vmem:[%s2875_s3 + $0x10] sm:$0xff] %v1985_v4  ;;  %v1995_v8 = vmul.f32 %v2629_v5, %v1855_v23 }
 0x188   :  { %2006 = vst [vmem:[%s2875_s3 + $0x18] sm:$0xff] %v1986_v7  ;;  %v1996_v9 = vmul.f32 %v2631_v19, %v1856_v48 }
 0x189   :  { %2015 = vst [vmem:[%s2875_s3 + $0x60] sm:$0xff] %v1995_v8 }
 0x18a   :  { %2016 = vst [vmem:[%s2875_s3 + $0x68] sm:$0xff] %v1996_v9 }
 0x1a7   :  { %v1717_v13 = vpop.f32.mrb[12].mxu0 }
 0x1a8   :  { %v1851_v14 = vadd.f32 %v1828_v11, %v1717_v13  ;;  %v1719_v15 = vpop.f32.mrb[13].mxu0 }
 0x1a9   :  { %v1852_v16 = vadd.f32 %v1832_v12, %v1719_v15  ;;  %v1721_v17 = vpop.f32.mrb[14].mxu0 }
 0x1aa   :  { %v2244_v18 = vmul.f32 -1.442695, %v1851_v14  ;;  %v1861_v20 = vadd.f32 %v1828_v11, %v1721_v17  ;;  %v1723_v21 = vpop.f32.mrb[15].mxu0 }
 0x1ab   :  { %v2245_v22 = vmul.f32 -1.442695, %v1852_v16  ;;  %v1862_v6 = vadd.f32 %v1832_v12, %v1723_v21 }
 0x1ac   :  { %2632 = vpow2.f32 %v2244_v18  ;;  %v2254_v26 = vmul.f32 -1.442695, %v1861_v20 }
 0x1ad   :  { %2634 = vpow2.f32 %v2245_v22  ;;  %v2255_v30 = vmul.f32 -1.442695, %v1862_v6 }
 0x1ae   :  { %2636 = vpow2.f32 %v2254_v26 }
 0x1af   :  { %2638 = vpow2.f32 %v2255_v30 }
 0x1b6   :  { %v2633_v33 = vpop.eup %2632  ;;  %v1631_v36 = vpop.f32.mrb[8].mxu1 }
 0x1b7   :  { %v2635_v34 = vpop.eup %2634  ;;  %v1931_v35 = vadd.f32 1.0, %v2633_v33  ;;  %v1849_v39 = vadd.f32 %v1820_v31, %v1631_v36  ;;  %v1633_v40 = vpop.f32.mrb[9].mxu1 }
 0x1b8   :  { %v2637_v37 = vpop.eup %2636  ;;  %v1932_v38 = vadd.f32 1.0, %v2635_v34  ;;  %v1850_v43 = vadd.f32 %v1824_v32, %v1633_v40  ;;  %v1635_v44 = vpop.f32.mrb[10].mxu1 }
 0x1b9   :  { %v2639_v41 = vpop.eup %2638  ;;  %2640 = vrcp.f32 %v1931_v35  ;;  %v1941_v42 = vadd.f32 1.0, %v2637_v37  ;;  %v2242_v27 = vmul.f32 -1.442695, %v1849_v39  ;;  %v1859_v46 = vadd.f32 %v1820_v31, %v1635_v44  ;;  %v1637_v23 = vpop.f32.mrb[11].mxu1 }
 0x1ba   :  { %2642 = vrcp.f32 %v1932_v38  ;;  %v1942_v45 = vadd.f32 1.0, %v2639_v41  ;;  %v2243_v28 = vmul.f32 -1.442695, %v1850_v43  ;;  %v1860_v47 = vadd.f32 %v1824_v32, %v1637_v23 }
 0x1bb   :  { %2644 = vrcp.f32 %v1941_v42  ;;  %v2252_v48 = vmul.f32 -1.442695, %v1859_v46 }
 0x1bc   :  { %2646 = vrcp.f32 %v1942_v45  ;;  %v2253_v49 = vmul.f32 -1.442695, %v1860_v47 }
 0x1bd   :  { %2648 = vpow2.f32 %v2242_v27 }
 0x1be   :  { %2650 = vpow2.f32 %v2243_v28 }
 0x1bf   :  { %2652 = vpow2.f32 %v2252_v48 }
 0x1c0   :  { %2654 = vpow2.f32 %v2253_v49 }
 0x1c3   :  { %v2641_v24 = vpop.eup %2640 }
 0x1c4   :  { %v2643_v50 = vpop.eup %2642  ;;  %v1991_v52 = vmul.f32 %v2641_v24, %v1851_v14 }
 0x1c5   :  { %v2645_v53 = vpop.eup %2644  ;;  %v1992_v0 = vmul.f32 %v2643_v50, %v1852_v16 }
 0x1c6   :  { %v2647_v54 = vpop.eup %2646  ;;  %2011 = vst [vmem:[%s2875_s3 + $0x40] sm:$0xff] %v1991_v52  ;;  %v2001_v55 = vmul.f32 %v2645_v53, %v1861_v20 }
 0x1c7   :  { %v2649_v25 = vpop.eup %2648  ;;  %2012 = vst [vmem:[%s2875_s3 + $0x48] sm:$0xff] %v1992_v0  ;;  %v2002_v56 = vmul.f32 %v2647_v54, %v1862_v6 }
 0x1c8   :  { %v2651_v57 = vpop.eup %2650  ;;  %2021 = vst [vmem:[%s2875_s3 + $0x90] sm:$0xff] %v2001_v55  ;;  %v1929_v58 = vadd.f32 1.0, %v2649_v25 }
 0x1c9   :  { %v2653_v59 = vpop.eup %2652  ;;  %2022 = vst [vmem:[%s2875_s3 + $0x98] sm:$0xff] %v2002_v56  ;;  %v1930_v60 = vadd.f32 1.0, %v2651_v57 }
 0x1ca   :  { %v2655_v61 = vpop.eup %2654  ;;  %2656 = vrcp.f32 %v1929_v58  ;;  %v1939_v62 = vadd.f32 1.0, %v2653_v59 }
 0x1cb   :  { %2658 = vrcp.f32 %v1930_v60  ;;  %v1940_v63 = vadd.f32 1.0, %v2655_v61 }
 0x1cc   :  { %2660 = vrcp.f32 %v1939_v62 }
 0x1cd   :  { %2662 = vrcp.f32 %v1940_v63 }
 0x1d4   :  { %v2657_v1 = vpop.eup %2656 }
 0x1d5   :  { %v2659_v2 = vpop.eup %2658  ;;  %v1989_v3 = vmul.f32 %v2657_v1, %v1849_v39 }
 0x1d6   :  { %v2661_v4 = vpop.eup %2660  ;;  %v1990_v5 = vmul.f32 %v2659_v2, %v1850_v43 }
 0x1d7   :  { %v2663_v7 = vpop.eup %2662  ;;  %2009 = vst [vmem:[%s2875_s3 + $0x30] sm:$0xff] %v1989_v3  ;;  %v1999_v19 = vmul.f32 %v2661_v4, %v1859_v46 }
 0x1d8   :  { %2010 = vst [vmem:[%s2875_s3 + $0x38] sm:$0xff] %v1990_v5  ;;  %v2000_v8 = vmul.f32 %v2663_v7, %v1860_v47 }
 0x1d9   :  { %2019 = vst [vmem:[%s2875_s3 + $0x80] sm:$0xff] %v1999_v19 }
 0x1da   :  { %2020 = vst [vmem:[%s2875_s3 + $0x88] sm:$0xff] %v2000_v8 }
 0x1db   :  { %2027 = vsyncpa [#allocation4], 1 }

</bundles_post_ra>
